<compile_context>
chip_gen: v7x
topology: tpu7x:2x2x1
jax: 0.10.0
libtpu: 0.0.40
codegen_flags: <defaults>
</compile_context>

<pallas_src>
import jax
import jax.numpy as jnp
from jax.experimental import pallas as pl
from jax.experimental.pallas import tpu as pltpu

# ------------------------- small, module-consistent config -------------------------
B = 2
CHANS = 8            # Chans
SAMPLES = 128        # Samples (divisible by 32; lane-dense)
KERN_LEN = 16        # kernLength
F1 = 4
D = 2
F2 = 8
NB_CLASSES = 4
SEP_KLEN = 16        # SeparableConv2d temporal kernel (fixed to 16 in module)
NR = 1.0             # ConstrainedConv2d max-norm
BN_EPS = 1e-5
# norm_rate is stored by the module but the SSVEP dense is a plain nn.Linear.

C2 = F1 * D                      # channels after depthwise spatial conv
S4 = SAMPLES // 4                # after AvgPool(1,4)
S32 = S4 // 8                    # after AvgPool(1,8)
FLAT = F2 * S32                  # flattened feature size
LPAD1 = (KERN_LEN - 1) // 2      # PyTorch 'same' even-kernel: left=7, right=8
LPAD2 = (SEP_KLEN - 1) // 2
TP1 = SAMPLES + KERN_LEN - 1     # padded length for block1 temporal conv
TP2 = S4 + SEP_KLEN - 1          # padded length for block2 depthwise conv

# Whole batch lane-folded into ONE grid step (best for single-TC v5e/v6e; on v7x
# with larger batches set BSTEP = B // 2 to feed both TensorCores).
BSTEP = B
NSTEPS = B // BSTEP


def _elu(x):
    return jnp.where(x > 0, x, jnp.exp(jnp.minimum(x, 0.0)) - 1.0)


# ------------------------------------ fused kernel ----------------------------------
def _eegnet_ssvep_kernel(
    x_ref, wcomb_ref, bcomb_ref, pool4_ref, wsep_ref, h3_ref, gd_ref, db_ref,
    o_ref,
    pad1, col1, pad2, col2,
):
    # Zero ONLY the halo lanes of the padded scratches (unconditionally; cheap).
    pad1[:, :LPAD1] = jnp.zeros((CHANS, LPAD1), jnp.float32)
    pad1[:, LPAD1 + SAMPLES:] = jnp.zeros((CHANS, TP1 - LPAD1 - SAMPLES), jnp.float32)
    pad2[:, :LPAD2] = jnp.zeros((C2, LPAD2), jnp.float32)
    pad2[:, LPAD2 + S4:] = jnp.zeros((C2, TP2 - LPAD2 - S4), jnp.float32)

    # ---- block1: im2col over lane-folded batch + ONE fused matmul ----------------
    # (temporal conv + BN1 + grouped spatial conv + BN2 all folded into wcomb/bcomb)
    for b in range(BSTEP):
        pad1[:, LPAD1:LPAD1 + SAMPLES] = x_ref[b, 0]               # (Chans, Samples)
        for k in range(KERN_LEN):
            col1[k * CHANS:(k + 1) * CHANS, b * SAMPLES:(b + 1) * SAMPLES] = \
                pad1[:, k:k + SAMPLES]
    z = jnp.dot(wcomb_ref[...], col1[...],
                preferred_element_type=jnp.float32)                # (C2, B*Samples)
    z = _elu(z + bcomb_ref[...])                                   # BN1+BN2 folded, ELU

    # ---- AvgPool2d((1,4)) as one matmul (block-diag per sample by construction) --
    zp = jnp.dot(z, pool4_ref[...], preferred_element_type=jnp.float32)  # (C2, B*S4)

    # ---- block2: separable conv (depthwise*pointwise*BN3 folded) via im2col ------
    for b in range(BSTEP):
        pad2[:, LPAD2:LPAD2 + S4] = zp[:, b * S4:(b + 1) * S4]
        for k in range(SEP_KLEN):
            col2[k * C2:(k + 1) * C2, b * S4:(b + 1) * S4] = pad2[:, k:k + S4]
    u = jnp.dot(wsep_ref[...], col2[...], preferred_element_type=jnp.float32)
    u = _elu(u + h3_ref[...])                                      # (F2, B*S4)

    # ---- head: AvgPool(1,8)+flatten+Linear folded into gd; softmax per sample ----
    for b in range(BSTEP):
        u_b = u[:, b * S4:(b + 1) * S4]                            # (F2, S4)
        prod = gd_ref[...] * u_b[None, :, :]                       # (nc, F2, S4) VPU
        red = jnp.sum(prod, axis=2)                                # (nc, F2)
        logits = jnp.sum(red, axis=1, keepdims=True) + db_ref[...]  # (nc, 1)
        m = jnp.max(logits, axis=0, keepdims=True)
        e = jnp.exp(logits - m)
        o_ref[:, b:b + 1] = e / jnp.sum(e, axis=0, keepdims=True)


# ------------------------------------ forward wrapper -------------------------------
def eegnet_ssvep_forward(x, kp):
    b = x.shape[0]
    nsteps = b // BSTEP
    out = pl.pallas_call(
        _eegnet_ssvep_kernel,
        out_shape=jax.ShapeDtypeStruct((NB_CLASSES, b), jnp.float32),
        grid=(nsteps,),
        in_specs=[
            pl.BlockSpec((BSTEP, 1, CHANS, SAMPLES), lambda i: (i, 0, 0, 0)),
            pl.BlockSpec((C2, KERN_LEN * CHANS), lambda i: (0, 0)),
            pl.BlockSpec((C2, 1), lambda i: (0, 0)),
            pl.BlockSpec((BSTEP * SAMPLES, BSTEP * S4), lambda i: (0, 0)),
            pl.BlockSpec((F2, SEP_KLEN * C2), lambda i: (0, 0)),
            pl.BlockSpec((F2, 1), lambda i: (0, 0)),
            pl.BlockSpec((NB_CLASSES, F2, S4), lambda i: (0, 0, 0)),
            pl.BlockSpec((NB_CLASSES, 1), lambda i: (0, 0)),
        ],
        out_specs=pl.BlockSpec((NB_CLASSES, BSTEP), lambda i: (0, i)),
        scratch_shapes=[
            pltpu.VMEM((CHANS, TP1), jnp.float32),                      # block1 pad
            pltpu.VMEM((KERN_LEN * CHANS, BSTEP * SAMPLES), jnp.float32),  # block1 im2col
            pltpu.VMEM((C2, TP2), jnp.float32),                         # block2 pad
            pltpu.VMEM((SEP_KLEN * C2, BSTEP * S4), jnp.float32),        # block2 im2col
        ],
        compiler_params=pltpu.CompilerParams(dimension_semantics=("parallel",)),
    )(x, kp["wcomb"], kp["bcomb"], kp["pool4"], kp["wsep"], kp["h3"],
      kp["gd"], kp["db"])
    return out.T                                                     # (B, nb_classes)


# ------------------------------------ parameters ------------------------------------
def _renorm_rows(w, maxnorm):
    # torch.renorm(w, p=2, dim=0, maxnorm): rescale rows whose L2 norm exceeds maxnorm.
    flat = w.reshape(w.shape[0], -1)
    nrm = jnp.sqrt(jnp.sum(flat * flat, axis=1))
    fac = jnp.where(nrm > maxnorm, maxnorm / (nrm + 1e-7), 1.0)
    return w * fac.reshape((w.shape[0],) + (1,) * (w.ndim - 1))


def _fold_bn(gamma, beta, mean, var):
    scale = gamma / jnp.sqrt(var + BN_EPS)
    shift = beta - mean * scale
    return scale, shift


def init_model_params(key):
    ks = jax.random.split(key, 18)

    def normal(k, shape, s=0.1):
        return s * jax.random.normal(k, shape, jnp.float32)

    def bn(k0, k1, k2, k3, c):
        gamma = 1.0 + 0.1 * jax.random.normal(k0, (c,), jnp.float32)
        beta = 0.1 * jax.random.normal(k1, (c,), jnp.float32)
        mean = 0.1 * jax.random.normal(k2, (c,), jnp.float32)
        var = jax.random.uniform(k3, (c,), jnp.float32, 0.5, 1.5)
        return _fold_bn(gamma, beta, mean, var)

    w1 = normal(ks[0], (F1, KERN_LEN))                         # Conv2d(1, F1, (1,K))
    s1, h1 = bn(ks[1], ks[2], ks[3], ks[4], F1)
    w2 = _renorm_rows(normal(ks[5], (C2, 1, CHANS, 1)), NR).reshape(C2, CHANS)  # constrained
    s2, h2 = bn(ks[6], ks[7], ks[8], ks[9], C2)
    wd = normal(ks[10], (C2, SEP_KLEN))                        # separable: depthwise
    wp = normal(ks[11], (F2, C2))                              # separable: pointwise
    s3, h3 = bn(ks[12], ks[13], ks[14], ks[15], F2)
    w_dense = normal(ks[16], (NB_CLASSES, FLAT))               # nn.Linear
    b_dense = normal(ks[17], (NB_CLASSES,))
    return dict(w1=w1, s1=s1, h1=h1, w2=w2, s2=s2, h2=h2, wd=wd, wp=wp,
                s3=s3, h3=h3, w_dense=w_dense, b_dense=b_dense)


def pack_kernel_params(p):
    g = jnp.arange(C2) // D                                    # group per output channel

    # block1 fused: Wcomb[o, k*C+c] = s2[o]*s1[g]*w2[o,c]*w1[g,k]
    scale_o = p["s2"] * p["s1"][g]                             # (C2,)
    w1g = p["w1"][g]                                           # (C2, K)
    wcomb = (scale_o[:, None, None] * w1g[:, :, None] *
             p["w2"][:, None, :]).reshape(C2, KERN_LEN * CHANS)
    bcomb = (p["s2"] * p["h1"][g] * jnp.sum(p["w2"], axis=1) +
             p["h2"]).reshape(C2, 1)

    # AvgPool(1,4) as a matmul; S/4 == S4, so i//4 == j is block-diagonal per sample.
    pool4 = ((jnp.arange(BSTEP * SAMPLES)[:, None] // 4) ==
             jnp.arange(BSTEP * S4)[None, :]).astype(jnp.float32) / 4.0

    # block2 fused: Wsep[f, k*C2+c] = s3[f]*wp[f,c]*wd[c,k]; bias = h3
    wsep = (p["s3"][:, None, None] * p["wd"].T[None, :, :] *
            p["wp"][:, None, :]).reshape(F2, SEP_KLEN * C2)
    h3 = p["h3"].reshape(F2, 1)

    # AvgPool(1,8) + flatten + Linear folded, class-major lane-dense layout:
    # gd[n, f, t] = W[n, f*S32 + t//8] / 8
    wr = p["w_dense"].reshape(NB_CLASSES, F2, S32)
    gd = jnp.repeat(wr, S4 // S32, axis=2) / 8.0               # (nc, F2, S4)
    db = p["b_dense"].reshape(NB_CLASSES, 1)

    return dict(wcomb=wcomb, bcomb=bcomb, pool4=pool4, wsep=wsep, h3=h3,
                gd=gd, db=db)


# --------------------------- pure-JAX reference (for checking) ----------------------
def reference_forward(x, p):
    b = x.shape[0]
    xs = x[:, 0]                                               # (B, Chans, S)
    xpad = jnp.pad(xs, ((0, 0), (0, 0), (LPAD1, KERN_LEN - 1 - LPAD1)))
    win = jnp.stack([xpad[:, :, k:k + SAMPLES] for k in range(KERN_LEN)], axis=2)
    y1 = jnp.einsum("fk,bckt->bfct", p["w1"], win)             # (B,F1,Chans,S)
    y1 = y1 * p["s1"][None, :, None, None] + p["h1"][None, :, None, None]
    grp = jnp.arange(C2) // D
    z = jnp.einsum("oc,boct->bot", p["w2"], y1[:, grp])        # (B,C2,S)
    z = _elu(z * p["s2"][None, :, None] + p["h2"][None, :, None])
    zp = z.reshape(b, C2, S4, 4).mean(-1)                      # AvgPool(1,4)
    zpad = jnp.pad(zp, ((0, 0), (0, 0), (LPAD2, SEP_KLEN - 1 - LPAD2)))
    win2 = jnp.stack([zpad[:, :, k:k + S4] for k in range(SEP_KLEN)], axis=2)
    dw = jnp.einsum("ck,bckt->bct", p["wd"], win2)             # depthwise
    u = jnp.einsum("fc,bct->bft", p["wp"], dw)                 # pointwise
    u = _elu(u * p["s3"][None, :, None] + p["h3"][None, :, None])
    up = u.reshape(b, F2, S32, 8).mean(-1)                     # AvgPool(1,8)
    flat = up.reshape(b, FLAT)
    logits = flat @ p["w_dense"].T + p["b_dense"][None, :]
    return jax.nn.softmax(logits, axis=1)


if __name__ == "__main__":
    key = jax.random.PRNGKey(0)
    kx, kparam = jax.random.split(key)
    # input layout: (B, 1, Chans, Samples) — same NCHW layout as the PyTorch module
    x = jax.random.normal(kx, (B, 1, CHANS, SAMPLES), jnp.float32)
    model = init_model_params(kparam)
    packed = pack_kernel_params(model)

    out = jax.jit(eegnet_ssvep_forward)(x, packed)
    out = jax.block_until_ready(out)
    assert out.shape == (B, NB_CLASSES)

    ref = reference_forward(x, model)
    assert jnp.allclose(out, ref, atol=1e-5, rtol=1e-4), "kernel/reference mismatch"
    print("KERNEL_OK")
</pallas_src>

<mosaic_0001>
module attributes {stable_mosaic.version = 11 : i64} {
  func.func @_eegnet_ssvep_kernel(%arg0: i32, %arg1: memref<2x1x8x128xf32, #tpu.memory_space<vmem>>, %arg2: memref<8x128xf32, #tpu.memory_space<vmem>>, %arg3: memref<8x1xf32, #tpu.memory_space<vmem>>, %arg4: memref<256x64xf32, #tpu.memory_space<vmem>>, %arg5: memref<8x128xf32, #tpu.memory_space<vmem>>, %arg6: memref<8x1xf32, #tpu.memory_space<vmem>>, %arg7: memref<4x8x32xf32, #tpu.memory_space<vmem>>, %arg8: memref<4x1xf32, #tpu.memory_space<vmem>>, %arg9: memref<4x2xf32, #tpu.memory_space<vmem>>, %arg10: memref<8x143xf32, #tpu.memory_space<vmem>>, %arg11: memref<128x256xf32, #tpu.memory_space<vmem>>, %arg12: memref<8x47xf32, #tpu.memory_space<vmem>>, %arg13: memref<128x64xf32, #tpu.memory_space<vmem>>) attributes {dimension_semantics = [#tpu.dimension_semantics<parallel>], iteration_bounds = array<i64: 1>, scalar_prefetch = 0 : i64, scratch_operands = 4 : i64, tpu.core_type = #tpu.core_type<tc>, window_params = [{transform_indices = @transform_0, window_bounds = array<i64: 2, 1, 8, 128>}, {pipeline_mode = #tpu.pipeline_mode<synchronous>, transform_indices = @transform_1, window_bounds = array<i64: 8, 128>}, {pipeline_mode = #tpu.pipeline_mode<synchronous>, transform_indices = @transform_2, window_bounds = array<i64: 8, 1>}, {pipeline_mode = #tpu.pipeline_mode<synchronous>, transform_indices = @transform_3, window_bounds = array<i64: 256, 64>}, {pipeline_mode = #tpu.pipeline_mode<synchronous>, transform_indices = @transform_4, window_bounds = array<i64: 8, 128>}, {pipeline_mode = #tpu.pipeline_mode<synchronous>, transform_indices = @transform_5, window_bounds = array<i64: 8, 1>}, {pipeline_mode = #tpu.pipeline_mode<synchronous>, transform_indices = @transform_6, window_bounds = array<i64: 4, 8, 32>}, {pipeline_mode = #tpu.pipeline_mode<synchronous>, transform_indices = @transform_7, window_bounds = array<i64: 4, 1>}, {transform_indices = @transform_8, window_bounds = array<i64: 4, 2>}]} {
    %cst = arith.constant 0.000000e+00 : f32
    %0 = vector.broadcast %cst : f32 to vector<8x7xf32>
    %c0 = arith.constant 0 : index
    %c0_0 = arith.constant 0 : index
    %1 = vector.load %arg10[%c0, %c0_0] : memref<8x143xf32, #tpu.memory_space<vmem>>, vector<8x7xf32>
    tpu.vector_store %arg10[%c0, %c0_0], %0 {strides = array<i32>} : memref<8x143xf32, #tpu.memory_space<vmem>>, vector<8x7xf32>,
    %cst_1 = arith.constant 0.000000e+00 : f32
    %2 = vector.broadcast %cst_1 : f32 to vector<8x8xf32>
    %c0_2 = arith.constant 0 : index
    %c135 = arith.constant 135 : index
    %3 = vector.load %arg10[%c0_2, %c135] : memref<8x143xf32, #tpu.memory_space<vmem>>, vector<8x8xf32>
    tpu.vector_store %arg10[%c0_2, %c135], %2 {strides = array<i32>} : memref<8x143xf32, #tpu.memory_space<vmem>>, vector<8x8xf32>,
    %cst_3 = arith.constant 0.000000e+00 : f32
    %4 = vector.broadcast %cst_3 : f32 to vector<8x7xf32>
    %c0_4 = arith.constant 0 : index
    %c0_5 = arith.constant 0 : index
    %5 = vector.load %arg12[%c0_4, %c0_5] : memref<8x47xf32, #tpu.memory_space<vmem>>, vector<8x7xf32>
    tpu.vector_store %arg12[%c0_4, %c0_5], %4 {strides = array<i32>} : memref<8x47xf32, #tpu.memory_space<vmem>>, vector<8x7xf32>,
    %cst_6 = arith.constant 0.000000e+00 : f32
    %6 = vector.broadcast %cst_6 : f32 to vector<8x8xf32>
    %c0_7 = arith.constant 0 : index
    %c39 = arith.constant 39 : index
    %7 = vector.load %arg12[%c0_7, %c39] : memref<8x47xf32, #tpu.memory_space<vmem>>, vector<8x8xf32>
    tpu.vector_store %arg12[%c0_7, %c39], %6 {strides = array<i32>} : memref<8x47xf32, #tpu.memory_space<vmem>>, vector<8x8xf32>,
    %c0_8 = arith.constant 0 : index
    %c0_9 = arith.constant 0 : index
    %c0_10 = arith.constant 0 : index
    %c0_11 = arith.constant 0 : index
    %8 = vector.load %arg1[%c0_8, %c0_9, %c0_10, %c0_11] : memref<2x1x8x128xf32, #tpu.memory_space<vmem>>, vector<1x1x8x128xf32>
    %9 = vector.shape_cast %8 : vector<1x1x8x128xf32> to vector<8x128xf32>
    %c0_12 = arith.constant 0 : index
    %c7 = arith.constant 7 : index
    %10 = vector.load %arg10[%c0_12, %c7] : memref<8x143xf32, #tpu.memory_space<vmem>>, vector<8x128xf32>
    tpu.vector_store %arg10[%c0_12, %c7], %9 {strides = array<i32>} : memref<8x143xf32, #tpu.memory_space<vmem>>, vector<8x128xf32>,
    %c0_13 = arith.constant 0 : index
    %c0_14 = arith.constant 0 : index
    %11 = vector.load %arg10[%c0_13, %c0_14] : memref<8x143xf32, #tpu.memory_space<vmem>>, vector<8x128xf32>
    %c0_15 = arith.constant 0 : index
    %c0_16 = arith.constant 0 : index
    %12 = vector.load %arg11[%c0_15, %c0_16] : memref<128x256xf32, #tpu.memory_space<vmem>>, vector<8x128xf32>
    tpu.vector_store %arg11[%c0_15, %c0_16], %11 {strides = array<i32>} : memref<128x256xf32, #tpu.memory_space<vmem>>, vector<8x128xf32>,
    %c0_17 = arith.constant 0 : index
    %c1 = arith.constant 1 : index
    %13 = vector.load %arg10[%c0_17, %c1] : memref<8x143xf32, #tpu.memory_space<vmem>>, vector<8x128xf32>
    %c8 = arith.constant 8 : index
    %c0_18 = arith.constant 0 : index
    %14 = vector.load %arg11[%c8, %c0_18] : memref<128x256xf32, #tpu.memory_space<vmem>>, vector<8x128xf32>
    tpu.vector_store %arg11[%c8, %c0_18], %13 {strides = array<i32>} : memref<128x256xf32, #tpu.memory_space<vmem>>, vector<8x128xf32>,
    %c0_19 = arith.constant 0 : index
    %c2 = arith.constant 2 : index
    %15 = vector.load %arg10[%c0_19, %c2] : memref<8x143xf32, #tpu.memory_space<vmem>>, vector<8x128xf32>
    %c16 = arith.constant 16 : index
    %c0_20 = arith.constant 0 : index
    %16 = vector.load %arg11[%c16, %c0_20] : memref<128x256xf32, #tpu.memory_space<vmem>>, vector<8x128xf32>
    tpu.vector_store %arg11[%c16, %c0_20], %15 {strides = array<i32>} : memref<128x256xf32, #tpu.memory_space<vmem>>, vector<8x128xf32>,
    %c0_21 = arith.constant 0 : index
    %c3 = arith.constant 3 : index
    %17 = vector.load %arg10[%c0_21, %c3] : memref<8x143xf32, #tpu.memory_space<vmem>>, vector<8x128xf32>
    %c24 = arith.constant 24 : index
    %c0_22 = arith.constant 0 : index
    %18 = vector.load %arg11[%c24, %c0_22] : memref<128x256xf32, #tpu.memory_space<vmem>>, vector<8x128xf32>
    tpu.vector_store %arg11[%c24, %c0_22], %17 {strides = array<i32>} : memref<128x256xf32, #tpu.memory_space<vmem>>, vector<8x128xf32>,
    %c0_23 = arith.constant 0 : index
    %c4 = arith.constant 4 : index
    %19 = vector.load %arg10[%c0_23, %c4] : memref<8x143xf32, #tpu.memory_space<vmem>>, vector<8x128xf32>
    %c32 = arith.constant 32 : index
    %c0_24 = arith.constant 0 : index
    %20 = vector.load %arg11[%c32, %c0_24] : memref<128x256xf32, #tpu.memory_space<vmem>>, vector<8x128xf32>
    tpu.vector_store %arg11[%c32, %c0_24], %19 {strides = array<i32>} : memref<128x256xf32, #tpu.memory_space<vmem>>, vector<8x128xf32>,
    %c0_25 = arith.constant 0 : index
    %c5 = arith.constant 5 : index
    %21 = vector.load %arg10[%c0_25, %c5] : memref<8x143xf32, #tpu.memory_space<vmem>>, vector<8x128xf32>
    %c40 = arith.constant 40 : index
    %c0_26 = arith.constant 0 : index
    %22 = vector.load %arg11[%c40, %c0_26] : memref<128x256xf32, #tpu.memory_space<vmem>>, vector<8x128xf32>
    tpu.vector_store %arg11[%c40, %c0_26], %21 {strides = array<i32>} : memref<128x256xf32, #tpu.memory_space<vmem>>, vector<8x128xf32>,
    %c0_27 = arith.constant 0 : index
    %c6 = arith.constant 6 : index
    %23 = vector.load %arg10[%c0_27, %c6] : memref<8x143xf32, #tpu.memory_space<vmem>>, vector<8x128xf32>
    %c48 = arith.constant 48 : index
    %c0_28 = arith.constant 0 : index
    %24 = vector.load %arg11[%c48, %c0_28] : memref<128x256xf32, #tpu.memory_space<vmem>>, vector<8x128xf32>
    tpu.vector_store %arg11[%c48, %c0_28], %23 {strides = array<i32>} : memref<128x256xf32, #tpu.memory_space<vmem>>, vector<8x128xf32>,
    %c0_29 = arith.constant 0 : index
    %c7_30 = arith.constant 7 : index
    %25 = vector.load %arg10[%c0_29, %c7_30] : memref<8x143xf32, #tpu.memory_space<vmem>>, vector<8x128xf32>
    %c56 = arith.constant 56 : index
    %c0_31 = arith.constant 0 : index
    %26 = vector.load %arg11[%c56, %c0_31] : memref<128x256xf32, #tpu.memory_space<vmem>>, vector<8x128xf32>
    tpu.vector_store %arg11[%c56, %c0_31], %25 {strides = array<i32>} : memref<128x256xf32, #tpu.memory_space<vmem>>, vector<8x128xf32>,
    %c0_32 = arith.constant 0 : index
    %c8_33 = arith.constant 8 : index
    %27 = vector.load %arg10[%c0_32, %c8_33] : memref<8x143xf32, #tpu.memory_space<vmem>>, vector<8x128xf32>
    %c64 = arith.constant 64 : index
    %c0_34 = arith.constant 0 : index
    %28 = vector.load %arg11[%c64, %c0_34] : memref<128x256xf32, #tpu.memory_space<vmem>>, vector<8x128xf32>
    tpu.vector_store %arg11[%c64, %c0_34], %27 {strides = array<i32>} : memref<128x256xf32, #tpu.memory_space<vmem>>, vector<8x128xf32>,
    %c0_35 = arith.constant 0 : index
    %c9 = arith.constant 9 : index
    %29 = vector.load %arg10[%c0_35, %c9] : memref<8x143xf32, #tpu.memory_space<vmem>>, vector<8x128xf32>
    %c72 = arith.constant 72 : index
    %c0_36 = arith.constant 0 : index
    %30 = vector.load %arg11[%c72, %c0_36] : memref<128x256xf32, #tpu.memory_space<vmem>>, vector<8x128xf32>
    tpu.vector_store %arg11[%c72, %c0_36], %29 {strides = array<i32>} : memref<128x256xf32, #tpu.memory_space<vmem>>, vector<8x128xf32>,
    %c0_37 = arith.constant 0 : index
    %c10 = arith.constant 10 : index
    %31 = vector.load %arg10[%c0_37, %c10] : memref<8x143xf32, #tpu.memory_space<vmem>>, vector<8x128xf32>
    %c80 = arith.constant 80 : index
    %c0_38 = arith.constant 0 : index
    %32 = vector.load %arg11[%c80, %c0_38] : memref<128x256xf32, #tpu.memory_space<vmem>>, vector<8x128xf32>
    tpu.vector_store %arg11[%c80, %c0_38], %31 {strides = array<i32>} : memref<128x256xf32, #tpu.memory_space<vmem>>, vector<8x128xf32>,
    %c0_39 = arith.constant 0 : index
    %c11 = arith.constant 11 : index
    %33 = vector.load %arg10[%c0_39, %c11] : memref<8x143xf32, #tpu.memory_space<vmem>>, vector<8x128xf32>
    %c88 = arith.constant 88 : index
    %c0_40 = arith.constant 0 : index
    %34 = vector.load %arg11[%c88, %c0_40] : memref<128x256xf32, #tpu.memory_space<vmem>>, vector<8x128xf32>
    tpu.vector_store %arg11[%c88, %c0_40], %33 {strides = array<i32>} : memref<128x256xf32, #tpu.memory_space<vmem>>, vector<8x128xf32>,
    %c0_41 = arith.constant 0 : index
    %c12 = arith.constant 12 : index
    %35 = vector.load %arg10[%c0_41, %c12] : memref<8x143xf32, #tpu.memory_space<vmem>>, vector<8x128xf32>
    %c96 = arith.constant 96 : index
    %c0_42 = arith.constant 0 : index
    %36 = vector.load %arg11[%c96, %c0_42] : memref<128x256xf32, #tpu.memory_space<vmem>>, vector<8x128xf32>
    tpu.vector_store %arg11[%c96, %c0_42], %35 {strides = array<i32>} : memref<128x256xf32, #tpu.memory_space<vmem>>, vector<8x128xf32>,
    %c0_43 = arith.constant 0 : index
    %c13 = arith.constant 13 : index
    %37 = vector.load %arg10[%c0_43, %c13] : memref<8x143xf32, #tpu.memory_space<vmem>>, vector<8x128xf32>
    %c104 = arith.constant 104 : index
    %c0_44 = arith.constant 0 : index
    %38 = vector.load %arg11[%c104, %c0_44] : memref<128x256xf32, #tpu.memory_space<vmem>>, vector<8x128xf32>
    tpu.vector_store %arg11[%c104, %c0_44], %37 {strides = array<i32>} : memref<128x256xf32, #tpu.memory_space<vmem>>, vector<8x128xf32>,
    %c0_45 = arith.constant 0 : index
    %c14 = arith.constant 14 : index
    %39 = vector.load %arg10[%c0_45, %c14] : memref<8x143xf32, #tpu.memory_space<vmem>>, vector<8x128xf32>
    %c112 = arith.constant 112 : index
    %c0_46 = arith.constant 0 : index
    %40 = vector.load %arg11[%c112, %c0_46] : memref<128x256xf32, #tpu.memory_space<vmem>>, vector<8x128xf32>
    tpu.vector_store %arg11[%c112, %c0_46], %39 {strides = array<i32>} : memref<128x256xf32, #tpu.memory_space<vmem>>, vector<8x128xf32>,
    %c0_47 = arith.constant 0 : index
    %c15 = arith.constant 15 : index
    %41 = vector.load %arg10[%c0_47, %c15] : memref<8x143xf32, #tpu.memory_space<vmem>>, vector<8x128xf32>
    %c120 = arith.constant 120 : index
    %c0_48 = arith.constant 0 : index
    %42 = vector.load %arg11[%c120, %c0_48] : memref<128x256xf32, #tpu.memory_space<vmem>>, vector<8x128xf32>
    tpu.vector_store %arg11[%c120, %c0_48], %41 {strides = array<i32>} : memref<128x256xf32, #tpu.memory_space<vmem>>, vector<8x128xf32>,
    %c1_49 = arith.constant 1 : index
    %c0_50 = arith.constant 0 : index
    %c0_51 = arith.constant 0 : index
    %c0_52 = arith.constant 0 : index
    %43 = vector.load %arg1[%c1_49, %c0_50, %c0_51, %c0_52] : memref<2x1x8x128xf32, #tpu.memory_space<vmem>>, vector<1x1x8x128xf32>
    %44 = vector.shape_cast %43 : vector<1x1x8x128xf32> to vector<8x128xf32>
    %c0_53 = arith.constant 0 : index
    %c7_54 = arith.constant 7 : index
    %45 = vector.load %arg10[%c0_53, %c7_54] : memref<8x143xf32, #tpu.memory_space<vmem>>, vector<8x128xf32>
    tpu.vector_store %arg10[%c0_53, %c7_54], %44 {strides = array<i32>} : memref<8x143xf32, #tpu.memory_space<vmem>>, vector<8x128xf32>,
    %c0_55 = arith.constant 0 : index
    %c0_56 = arith.constant 0 : index
    %46 = vector.load %arg10[%c0_55, %c0_56] : memref<8x143xf32, #tpu.memory_space<vmem>>, vector<8x128xf32>
    %c0_57 = arith.constant 0 : index
    %c128 = arith.constant 128 : index
    %47 = vector.load %arg11[%c0_57, %c128] : memref<128x256xf32, #tpu.memory_space<vmem>>, vector<8x128xf32>
    tpu.vector_store %arg11[%c0_57, %c128], %46 {strides = array<i32>} : memref<128x256xf32, #tpu.memory_space<vmem>>, vector<8x128xf32>,
    %c0_58 = arith.constant 0 : index
    %c1_59 = arith.constant 1 : index
    %48 = vector.load %arg10[%c0_58, %c1_59] : memref<8x143xf32, #tpu.memory_space<vmem>>, vector<8x128xf32>
    %c8_60 = arith.constant 8 : index
    %c128_61 = arith.constant 128 : index
    %49 = vector.load %arg11[%c8_60, %c128_61] : memref<128x256xf32, #tpu.memory_space<vmem>>, vector<8x128xf32>
    tpu.vector_store %arg11[%c8_60, %c128_61], %48 {strides = array<i32>} : memref<128x256xf32, #tpu.memory_space<vmem>>, vector<8x128xf32>,
    %c0_62 = arith.constant 0 : index
    %c2_63 = arith.constant 2 : index
    %50 = vector.load %arg10[%c0_62, %c2_63] : memref<8x143xf32, #tpu.memory_space<vmem>>, vector<8x128xf32>
    %c16_64 = arith.constant 16 : index
    %c128_65 = arith.constant 128 : index
    %51 = vector.load %arg11[%c16_64, %c128_65] : memref<128x256xf32, #tpu.memory_space<vmem>>, vector<8x128xf32>
    tpu.vector_store %arg11[%c16_64, %c128_65], %50 {strides = array<i32>} : memref<128x256xf32, #tpu.memory_space<vmem>>, vector<8x128xf32>,
    %c0_66 = arith.constant 0 : index
    %c3_67 = arith.constant 3 : index
    %52 = vector.load %arg10[%c0_66, %c3_67] : memref<8x143xf32, #tpu.memory_space<vmem>>, vector<8x128xf32>
    %c24_68 = arith.constant 24 : index
    %c128_69 = arith.constant 128 : index
    %53 = vector.load %arg11[%c24_68, %c128_69] : memref<128x256xf32, #tpu.memory_space<vmem>>, vector<8x128xf32>
    tpu.vector_store %arg11[%c24_68, %c128_69], %52 {strides = array<i32>} : memref<128x256xf32, #tpu.memory_space<vmem>>, vector<8x128xf32>,
    %c0_70 = arith.constant 0 : index
    %c4_71 = arith.constant 4 : index
    %54 = vector.load %arg10[%c0_70, %c4_71] : memref<8x143xf32, #tpu.memory_space<vmem>>, vector<8x128xf32>
    %c32_72 = arith.constant 32 : index
    %c128_73 = arith.constant 128 : index
    %55 = vector.load %arg11[%c32_72, %c128_73] : memref<128x256xf32, #tpu.memory_space<vmem>>, vector<8x128xf32>
    tpu.vector_store %arg11[%c32_72, %c128_73], %54 {strides = array<i32>} : memref<128x256xf32, #tpu.memory_space<vmem>>, vector<8x128xf32>,
    %c0_74 = arith.constant 0 : index
    %c5_75 = arith.constant 5 : index
    %56 = vector.load %arg10[%c0_74, %c5_75] : memref<8x143xf32, #tpu.memory_space<vmem>>, vector<8x128xf32>
    %c40_76 = arith.constant 40 : index
    %c128_77 = arith.constant 128 : index
    %57 = vector.load %arg11[%c40_76, %c128_77] : memref<128x256xf32, #tpu.memory_space<vmem>>, vector<8x128xf32>
    tpu.vector_store %arg11[%c40_76, %c128_77], %56 {strides = array<i32>} : memref<128x256xf32, #tpu.memory_space<vmem>>, vector<8x128xf32>,
    %c0_78 = arith.constant 0 : index
    %c6_79 = arith.constant 6 : index
    %58 = vector.load %arg10[%c0_78, %c6_79] : memref<8x143xf32, #tpu.memory_space<vmem>>, vector<8x128xf32>
    %c48_80 = arith.constant 48 : index
    %c128_81 = arith.constant 128 : index
    %59 = vector.load %arg11[%c48_80, %c128_81] : memref<128x256xf32, #tpu.memory_space<vmem>>, vector<8x128xf32>
    tpu.vector_store %arg11[%c48_80, %c128_81], %58 {strides = array<i32>} : memref<128x256xf32, #tpu.memory_space<vmem>>, vector<8x128xf32>,
    %c0_82 = arith.constant 0 : index
    %c7_83 = arith.constant 7 : index
    %60 = vector.load %arg10[%c0_82, %c7_83] : memref<8x143xf32, #tpu.memory_space<vmem>>, vector<8x128xf32>
    %c56_84 = arith.constant 56 : index
    %c128_85 = arith.constant 128 : index
    %61 = vector.load %arg11[%c56_84, %c128_85] : memref<128x256xf32, #tpu.memory_space<vmem>>, vector<8x128xf32>
    tpu.vector_store %arg11[%c56_84, %c128_85], %60 {strides = array<i32>} : memref<128x256xf32, #tpu.memory_space<vmem>>, vector<8x128xf32>,
    %c0_86 = arith.constant 0 : index
    %c8_87 = arith.constant 8 : index
    %62 = vector.load %arg10[%c0_86, %c8_87] : memref<8x143xf32, #tpu.memory_space<vmem>>, vector<8x128xf32>
    %c64_88 = arith.constant 64 : index
    %c128_89 = arith.constant 128 : index
    %63 = vector.load %arg11[%c64_88, %c128_89] : memref<128x256xf32, #tpu.memory_space<vmem>>, vector<8x128xf32>
    tpu.vector_store %arg11[%c64_88, %c128_89], %62 {strides = array<i32>} : memref<128x256xf32, #tpu.memory_space<vmem>>, vector<8x128xf32>,
    %c0_90 = arith.constant 0 : index
    %c9_91 = arith.constant 9 : index
    %64 = vector.load %arg10[%c0_90, %c9_91] : memref<8x143xf32, #tpu.memory_space<vmem>>, vector<8x128xf32>
    %c72_92 = arith.constant 72 : index
    %c128_93 = arith.constant 128 : index
    %65 = vector.load %arg11[%c72_92, %c128_93] : memref<128x256xf32, #tpu.memory_space<vmem>>, vector<8x128xf32>
    tpu.vector_store %arg11[%c72_92, %c128_93], %64 {strides = array<i32>} : memref<128x256xf32, #tpu.memory_space<vmem>>, vector<8x128xf32>,
    %c0_94 = arith.constant 0 : index
    %c10_95 = arith.constant 10 : index
    %66 = vector.load %arg10[%c0_94, %c10_95] : memref<8x143xf32, #tpu.memory_space<vmem>>, vector<8x128xf32>
    %c80_96 = arith.constant 80 : index
    %c128_97 = arith.constant 128 : index
    %67 = vector.load %arg11[%c80_96, %c128_97] : memref<128x256xf32, #tpu.memory_space<vmem>>, vector<8x128xf32>
    tpu.vector_store %arg11[%c80_96, %c128_97], %66 {strides = array<i32>} : memref<128x256xf32, #tpu.memory_space<vmem>>, vector<8x128xf32>,
    %c0_98 = arith.constant 0 : index
    %c11_99 = arith.constant 11 : index
    %68 = vector.load %arg10[%c0_98, %c11_99] : memref<8x143xf32, #tpu.memory_space<vmem>>, vector<8x128xf32>
    %c88_100 = arith.constant 88 : index
    %c128_101 = arith.constant 128 : index
    %69 = vector.load %arg11[%c88_100, %c128_101] : memref<128x256xf32, #tpu.memory_space<vmem>>, vector<8x128xf32>
    tpu.vector_store %arg11[%c88_100, %c128_101], %68 {strides = array<i32>} : memref<128x256xf32, #tpu.memory_space<vmem>>, vector<8x128xf32>,
    %c0_102 = arith.constant 0 : index
    %c12_103 = arith.constant 12 : index
    %70 = vector.load %arg10[%c0_102, %c12_103] : memref<8x143xf32, #tpu.memory_space<vmem>>, vector<8x128xf32>
    %c96_104 = arith.constant 96 : index
    %c128_105 = arith.constant 128 : index
    %71 = vector.load %arg11[%c96_104, %c128_105] : memref<128x256xf32, #tpu.memory_space<vmem>>, vector<8x128xf32>
    tpu.vector_store %arg11[%c96_104, %c128_105], %70 {strides = array<i32>} : memref<128x256xf32, #tpu.memory_space<vmem>>, vector<8x128xf32>,
    %c0_106 = arith.constant 0 : index
    %c13_107 = arith.constant 13 : index
    %72 = vector.load %arg10[%c0_106, %c13_107] : memref<8x143xf32, #tpu.memory_space<vmem>>, vector<8x128xf32>
    %c104_108 = arith.constant 104 : index
    %c128_109 = arith.constant 128 : index
    %73 = vector.load %arg11[%c104_108, %c128_109] : memref<128x256xf32, #tpu.memory_space<vmem>>, vector<8x128xf32>
    tpu.vector_store %arg11[%c104_108, %c128_109], %72 {strides = array<i32>} : memref<128x256xf32, #tpu.memory_space<vmem>>, vector<8x128xf32>,
    %c0_110 = arith.constant 0 : index
    %c14_111 = arith.constant 14 : index
    %74 = vector.load %arg10[%c0_110, %c14_111] : memref<8x143xf32, #tpu.memory_space<vmem>>, vector<8x128xf32>
    %c112_112 = arith.constant 112 : index
    %c128_113 = arith.constant 128 : index
    %75 = vector.load %arg11[%c112_112, %c128_113] : memref<128x256xf32, #tpu.memory_space<vmem>>, vector<8x128xf32>
    tpu.vector_store %arg11[%c112_112, %c128_113], %74 {strides = array<i32>} : memref<128x256xf32, #tpu.memory_space<vmem>>, vector<8x128xf32>,
    %c0_114 = arith.constant 0 : index
    %c15_115 = arith.constant 15 : index
    %76 = vector.load %arg10[%c0_114, %c15_115] : memref<8x143xf32, #tpu.memory_space<vmem>>, vector<8x128xf32>
    %c120_116 = arith.constant 120 : index
    %c128_117 = arith.constant 128 : index
    %77 = vector.load %arg11[%c120_116, %c128_117] : memref<128x256xf32, #tpu.memory_space<vmem>>, vector<8x128xf32>
    tpu.vector_store %arg11[%c120_116, %c128_117], %76 {strides = array<i32>} : memref<128x256xf32, #tpu.memory_space<vmem>>, vector<8x128xf32>,
    %c0_118 = arith.constant 0 : index
    %c0_119 = arith.constant 0 : index
    %78 = vector.load %arg2[%c0_118, %c0_119] : memref<8x128xf32, #tpu.memory_space<vmem>>, vector<8x128xf32>
    %c0_120 = arith.constant 0 : index
    %c0_121 = arith.constant 0 : index
    %79 = vector.load %arg11[%c0_120, %c0_121] : memref<128x256xf32, #tpu.memory_space<vmem>>, vector<128x256xf32>
    %cst_122 = arith.constant dense<0.000000e+00> : vector<8x256xf32>
    %80 = tpu.matmul %78, %79, %cst_122 {dimension_numbers = #tpu.dot_dimension_numbers<[1], [0], [0], [1], [0, 0, 1, 1], [], []>} : vector<8x128xf32>, vector<128x256xf32>, vector<8x256xf32> -> vector<8x256xf32>
    %c0_123 = arith.constant 0 : index
    %c0_124 = arith.constant 0 : index
    %81 = vector.load %arg3[%c0_123, %c0_124] : memref<8x1xf32, #tpu.memory_space<vmem>>, vector<8x1xf32>
    %82 = vector.broadcast %81 : vector<8x1xf32> to vector<8x256xf32>
    %83 = arith.addf %80, %82 : vector<8x256xf32>
    %cst_125 = arith.constant 0.000000e+00 : f32
    %84 = vector.broadcast %cst_125 : f32 to vector<8x256xf32>
    %85 = arith.cmpf ogt, %83, %84 : vector<8x256xf32>
    %cst_126 = arith.constant 0.000000e+00 : f32
    %86 = vector.broadcast %cst_126 : f32 to vector<8x256xf32>
    %87 = arith.minimumf %83, %86 : vector<8x256xf32>
    %88 = math.exp %87 : vector<8x256xf32>
    %cst_127 = arith.constant 1.000000e+00 : f32
    %89 = vector.broadcast %cst_127 : f32 to vector<8x256xf32>
    %90 = arith.subf %88, %89 : vector<8x256xf32>
    %91 = arith.select %85, %83, %90 : vector<8x256xi1>, vector<8x256xf32>
    %c0_128 = arith.constant 0 : index
    %c0_129 = arith.constant 0 : index
    %92 = vector.load %arg4[%c0_128, %c0_129] : memref<256x64xf32, #tpu.memory_space<vmem>>, vector<256x64xf32>
    %cst_130 = arith.constant dense<0.000000e+00> : vector<8x64xf32>
    %93 = tpu.matmul %91, %92, %cst_130 {dimension_numbers = #tpu.dot_dimension_numbers<[1], [0], [0], [1], [0, 0, 1, 1], [], []>} : vector<8x256xf32>, vector<256x64xf32>, vector<8x64xf32> -> vector<8x64xf32>
    %94 = vector.extract_strided_slice %93 {offsets = [0, 0], sizes = [8, 32], strides = [1, 1]} : vector<8x64xf32> to vector<8x32xf32>
    %c0_131 = arith.constant 0 : index
    %c7_132 = arith.constant 7 : index
    %95 = vector.load %arg12[%c0_131, %c7_132] : memref<8x47xf32, #tpu.memory_space<vmem>>, vector<8x32xf32>
    tpu.vector_store %arg12[%c0_131, %c7_132], %94 {strides = array<i32>} : memref<8x47xf32, #tpu.memory_space<vmem>>, vector<8x32xf32>,
    %c0_133 = arith.constant 0 : index
    %c0_134 = arith.constant 0 : index
    %96 = vector.load %arg12[%c0_133, %c0_134] : memref<8x47xf32, #tpu.memory_space<vmem>>, vector<8x32xf32>
    %c0_135 = arith.constant 0 : index
    %c0_136 = arith.constant 0 : index
    %97 = vector.load %arg13[%c0_135, %c0_136] : memref<128x64xf32, #tpu.memory_space<vmem>>, vector<8x32xf32>
    tpu.vector_store %arg13[%c0_135, %c0_136], %96 {strides = array<i32>} : memref<128x64xf32, #tpu.memory_space<vmem>>, vector<8x32xf32>,
    %c0_137 = arith.constant 0 : index
    %c1_138 = arith.constant 1 : index
    %98 = vector.load %arg12[%c0_137, %c1_138] : memref<8x47xf32, #tpu.memory_space<vmem>>, vector<8x32xf32>
    %c8_139 = arith.constant 8 : index
    %c0_140 = arith.constant 0 : index
    %99 = vector.load %arg13[%c8_139, %c0_140] : memref<128x64xf32, #tpu.memory_space<vmem>>, vector<8x32xf32>
    tpu.vector_store %arg13[%c8_139, %c0_140], %98 {strides = array<i32>} : memref<128x64xf32, #tpu.memory_space<vmem>>, vector<8x32xf32>,
    %c0_141 = arith.constant 0 : index
    %c2_142 = arith.constant 2 : index
    %100 = vector.load %arg12[%c0_141, %c2_142] : memref<8x47xf32, #tpu.memory_space<vmem>>, vector<8x32xf32>
    %c16_143 = arith.constant 16 : index
    %c0_144 = arith.constant 0 : index
    %101 = vector.load %arg13[%c16_143, %c0_144] : memref<128x64xf32, #tpu.memory_space<vmem>>, vector<8x32xf32>
    tpu.vector_store %arg13[%c16_143, %c0_144], %100 {strides = array<i32>} : memref<128x64xf32, #tpu.memory_space<vmem>>, vector<8x32xf32>,
    %c0_145 = arith.constant 0 : index
    %c3_146 = arith.constant 3 : index
    %102 = vector.load %arg12[%c0_145, %c3_146] : memref<8x47xf32, #tpu.memory_space<vmem>>, vector<8x32xf32>
    %c24_147 = arith.constant 24 : index
    %c0_148 = arith.constant 0 : index
    %103 = vector.load %arg13[%c24_147, %c0_148] : memref<128x64xf32, #tpu.memory_space<vmem>>, vector<8x32xf32>
    tpu.vector_store %arg13[%c24_147, %c0_148], %102 {strides = array<i32>} : memref<128x64xf32, #tpu.memory_space<vmem>>, vector<8x32xf32>,
    %c0_149 = arith.constant 0 : index
    %c4_150 = arith.constant 4 : index
    %104 = vector.load %arg12[%c0_149, %c4_150] : memref<8x47xf32, #tpu.memory_space<vmem>>, vector<8x32xf32>
    %c32_151 = arith.constant 32 : index
    %c0_152 = arith.constant 0 : index
    %105 = vector.load %arg13[%c32_151, %c0_152] : memref<128x64xf32, #tpu.memory_space<vmem>>, vector<8x32xf32>
    tpu.vector_store %arg13[%c32_151, %c0_152], %104 {strides = array<i32>} : memref<128x64xf32, #tpu.memory_space<vmem>>, vector<8x32xf32>,
    %c0_153 = arith.constant 0 : index
    %c5_154 = arith.constant 5 : index
    %106 = vector.load %arg12[%c0_153, %c5_154] : memref<8x47xf32, #tpu.memory_space<vmem>>, vector<8x32xf32>
    %c40_155 = arith.constant 40 : index
    %c0_156 = arith.constant 0 : index
    %107 = vector.load %arg13[%c40_155, %c0_156] : memref<128x64xf32, #tpu.memory_space<vmem>>, vector<8x32xf32>
    tpu.vector_store %arg13[%c40_155, %c0_156], %106 {strides = array<i32>} : memref<128x64xf32, #tpu.memory_space<vmem>>, vector<8x32xf32>,
    %c0_157 = arith.constant 0 : index
    %c6_158 = arith.constant 6 : index
    %108 = vector.load %arg12[%c0_157, %c6_158] : memref<8x47xf32, #tpu.memory_space<vmem>>, vector<8x32xf32>
    %c48_159 = arith.constant 48 : index
    %c0_160 = arith.constant 0 : index
    %109 = vector.load %arg13[%c48_159, %c0_160] : memref<128x64xf32, #tpu.memory_space<vmem>>, vector<8x32xf32>
    tpu.vector_store %arg13[%c48_159, %c0_160], %108 {strides = array<i32>} : memref<128x64xf32, #tpu.memory_space<vmem>>, vector<8x32xf32>,
    %c0_161 = arith.constant 0 : index
    %c7_162 = arith.constant 7 : index
    %110 = vector.load %arg12[%c0_161, %c7_162] : memref<8x47xf32, #tpu.memory_space<vmem>>, vector<8x32xf32>
    %c56_163 = arith.constant 56 : index
    %c0_164 = arith.constant 0 : index
    %111 = vector.load %arg13[%c56_163, %c0_164] : memref<128x64xf32, #tpu.memory_space<vmem>>, vector<8x32xf32>
    tpu.vector_store %arg13[%c56_163, %c0_164], %110 {strides = array<i32>} : memref<128x64xf32, #tpu.memory_space<vmem>>, vector<8x32xf32>,
    %c0_165 = arith.constant 0 : index
    %c8_166 = arith.constant 8 : index
    %112 = vector.load %arg12[%c0_165, %c8_166] : memref<8x47xf32, #tpu.memory_space<vmem>>, vector<8x32xf32>
    %c64_167 = arith.constant 64 : index
    %c0_168 = arith.constant 0 : index
    %113 = vector.load %arg13[%c64_167, %c0_168] : memref<128x64xf32, #tpu.memory_space<vmem>>, vector<8x32xf32>
    tpu.vector_store %arg13[%c64_167, %c0_168], %112 {strides = array<i32>} : memref<128x64xf32, #tpu.memory_space<vmem>>, vector<8x32xf32>,
    %c0_169 = arith.constant 0 : index
    %c9_170 = arith.constant 9 : index
    %114 = vector.load %arg12[%c0_169, %c9_170] : memref<8x47xf32, #tpu.memory_space<vmem>>, vector<8x32xf32>
    %c72_171 = arith.constant 72 : index
    %c0_172 = arith.constant 0 : index
    %115 = vector.load %arg13[%c72_171, %c0_172] : memref<128x64xf32, #tpu.memory_space<vmem>>, vector<8x32xf32>
    tpu.vector_store %arg13[%c72_171, %c0_172], %114 {strides = array<i32>} : memref<128x64xf32, #tpu.memory_space<vmem>>, vector<8x32xf32>,
    %c0_173 = arith.constant 0 : index
    %c10_174 = arith.constant 10 : index
    %116 = vector.load %arg12[%c0_173, %c10_174] : memref<8x47xf32, #tpu.memory_space<vmem>>, vector<8x32xf32>
    %c80_175 = arith.constant 80 : index
    %c0_176 = arith.constant 0 : index
    %117 = vector.load %arg13[%c80_175, %c0_176] : memref<128x64xf32, #tpu.memory_space<vmem>>, vector<8x32xf32>
    tpu.vector_store %arg13[%c80_175, %c0_176], %116 {strides = array<i32>} : memref<128x64xf32, #tpu.memory_space<vmem>>, vector<8x32xf32>,
    %c0_177 = arith.constant 0 : index
    %c11_178 = arith.constant 11 : index
    %118 = vector.load %arg12[%c0_177, %c11_178] : memref<8x47xf32, #tpu.memory_space<vmem>>, vector<8x32xf32>
    %c88_179 = arith.constant 88 : index
    %c0_180 = arith.constant 0 : index
    %119 = vector.load %arg13[%c88_179, %c0_180] : memref<128x64xf32, #tpu.memory_space<vmem>>, vector<8x32xf32>
    tpu.vector_store %arg13[%c88_179, %c0_180], %118 {strides = array<i32>} : memref<128x64xf32, #tpu.memory_space<vmem>>, vector<8x32xf32>,
    %c0_181 = arith.constant 0 : index
    %c12_182 = arith.constant 12 : index
    %120 = vector.load %arg12[%c0_181, %c12_182] : memref<8x47xf32, #tpu.memory_space<vmem>>, vector<8x32xf32>
    %c96_183 = arith.constant 96 : index
    %c0_184 = arith.constant 0 : index
    %121 = vector.load %arg13[%c96_183, %c0_184] : memref<128x64xf32, #tpu.memory_space<vmem>>, vector<8x32xf32>
    tpu.vector_store %arg13[%c96_183, %c0_184], %120 {strides = array<i32>} : memref<128x64xf32, #tpu.memory_space<vmem>>, vector<8x32xf32>,
    %c0_185 = arith.constant 0 : index
    %c13_186 = arith.constant 13 : index
    %122 = vector.load %arg12[%c0_185, %c13_186] : memref<8x47xf32, #tpu.memory_space<vmem>>, vector<8x32xf32>
    %c104_187 = arith.constant 104 : index
    %c0_188 = arith.constant 0 : index
    %123 = vector.load %arg13[%c104_187, %c0_188] : memref<128x64xf32, #tpu.memory_space<vmem>>, vector<8x32xf32>
    tpu.vector_store %arg13[%c104_187, %c0_188], %122 {strides = array<i32>} : memref<128x64xf32, #tpu.memory_space<vmem>>, vector<8x32xf32>,
    %c0_189 = arith.constant 0 : index
    %c14_190 = arith.constant 14 : index
    %124 = vector.load %arg12[%c0_189, %c14_190] : memref<8x47xf32, #tpu.memory_space<vmem>>, vector<8x32xf32>
    %c112_191 = arith.constant 112 : index
    %c0_192 = arith.constant 0 : index
    %125 = vector.load %arg13[%c112_191, %c0_192] : memref<128x64xf32, #tpu.memory_space<vmem>>, vector<8x32xf32>
    tpu.vector_store %arg13[%c112_191, %c0_192], %124 {strides = array<i32>} : memref<128x64xf32, #tpu.memory_space<vmem>>, vector<8x32xf32>,
    %c0_193 = arith.constant 0 : index
    %c15_194 = arith.constant 15 : index
    %126 = vector.load %arg12[%c0_193, %c15_194] : memref<8x47xf32, #tpu.memory_space<vmem>>, vector<8x32xf32>
    %c120_195 = arith.constant 120 : index
    %c0_196 = arith.constant 0 : index
    %127 = vector.load %arg13[%c120_195, %c0_196] : memref<128x64xf32, #tpu.memory_space<vmem>>, vector<8x32xf32>
    tpu.vector_store %arg13[%c120_195, %c0_196], %126 {strides = array<i32>} : memref<128x64xf32, #tpu.memory_space<vmem>>, vector<8x32xf32>,
    %128 = vector.extract_strided_slice %93 {offsets = [0, 32], sizes = [8, 32], strides = [1, 1]} : vector<8x64xf32> to vector<8x32xf32>
    %c0_197 = arith.constant 0 : index
    %c7_198 = arith.constant 7 : index
    %129 = vector.load %arg12[%c0_197, %c7_198] : memref<8x47xf32, #tpu.memory_space<vmem>>, vector<8x32xf32>
    tpu.vector_store %arg12[%c0_197, %c7_198], %128 {strides = array<i32>} : memref<8x47xf32, #tpu.memory_space<vmem>>, vector<8x32xf32>,
    %c0_199 = arith.constant 0 : index
    %c0_200 = arith.constant 0 : index
    %130 = vector.load %arg12[%c0_199, %c0_200] : memref<8x47xf32, #tpu.memory_space<vmem>>, vector<8x32xf32>
    %c0_201 = arith.constant 0 : index
    %c32_202 = arith.constant 32 : index
    %131 = vector.load %arg13[%c0_201, %c32_202] : memref<128x64xf32, #tpu.memory_space<vmem>>, vector<8x32xf32>
    tpu.vector_store %arg13[%c0_201, %c32_202], %130 {strides = array<i32>} : memref<128x64xf32, #tpu.memory_space<vmem>>, vector<8x32xf32>,
    %c0_203 = arith.constant 0 : index
    %c1_204 = arith.constant 1 : index
    %132 = vector.load %arg12[%c0_203, %c1_204] : memref<8x47xf32, #tpu.memory_space<vmem>>, vector<8x32xf32>
    %c8_205 = arith.constant 8 : index
    %c32_206 = arith.constant 32 : index
    %133 = vector.load %arg13[%c8_205, %c32_206] : memref<128x64xf32, #tpu.memory_space<vmem>>, vector<8x32xf32>
    tpu.vector_store %arg13[%c8_205, %c32_206], %132 {strides = array<i32>} : memref<128x64xf32, #tpu.memory_space<vmem>>, vector<8x32xf32>,
    %c0_207 = arith.constant 0 : index
    %c2_208 = arith.constant 2 : index
    %134 = vector.load %arg12[%c0_207, %c2_208] : memref<8x47xf32, #tpu.memory_space<vmem>>, vector<8x32xf32>
    %c16_209 = arith.constant 16 : index
    %c32_210 = arith.constant 32 : index
    %135 = vector.load %arg13[%c16_209, %c32_210] : memref<128x64xf32, #tpu.memory_space<vmem>>, vector<8x32xf32>
    tpu.vector_store %arg13[%c16_209, %c32_210], %134 {strides = array<i32>} : memref<128x64xf32, #tpu.memory_space<vmem>>, vector<8x32xf32>,
    %c0_211 = arith.constant 0 : index
    %c3_212 = arith.constant 3 : index
    %136 = vector.load %arg12[%c0_211, %c3_212] : memref<8x47xf32, #tpu.memory_space<vmem>>, vector<8x32xf32>
    %c24_213 = arith.constant 24 : index
    %c32_214 = arith.constant 32 : index
    %137 = vector.load %arg13[%c24_213, %c32_214] : memref<128x64xf32, #tpu.memory_space<vmem>>, vector<8x32xf32>
    tpu.vector_store %arg13[%c24_213, %c32_214], %136 {strides = array<i32>} : memref<128x64xf32, #tpu.memory_space<vmem>>, vector<8x32xf32>,
    %c0_215 = arith.constant 0 : index
    %c4_216 = arith.constant 4 : index
    %138 = vector.load %arg12[%c0_215, %c4_216] : memref<8x47xf32, #tpu.memory_space<vmem>>, vector<8x32xf32>
    %c32_217 = arith.constant 32 : index
    %c32_218 = arith.constant 32 : index
    %139 = vector.load %arg13[%c32_217, %c32_218] : memref<128x64xf32, #tpu.memory_space<vmem>>, vector<8x32xf32>
    tpu.vector_store %arg13[%c32_217, %c32_218], %138 {strides = array<i32>} : memref<128x64xf32, #tpu.memory_space<vmem>>, vector<8x32xf32>,
    %c0_219 = arith.constant 0 : index
    %c5_220 = arith.constant 5 : index
    %140 = vector.load %arg12[%c0_219, %c5_220] : memref<8x47xf32, #tpu.memory_space<vmem>>, vector<8x32xf32>
    %c40_221 = arith.constant 40 : index
    %c32_222 = arith.constant 32 : index
    %141 = vector.load %arg13[%c40_221, %c32_222] : memref<128x64xf32, #tpu.memory_space<vmem>>, vector<8x32xf32>
    tpu.vector_store %arg13[%c40_221, %c32_222], %140 {strides = array<i32>} : memref<128x64xf32, #tpu.memory_space<vmem>>, vector<8x32xf32>,
    %c0_223 = arith.constant 0 : index
    %c6_224 = arith.constant 6 : index
    %142 = vector.load %arg12[%c0_223, %c6_224] : memref<8x47xf32, #tpu.memory_space<vmem>>, vector<8x32xf32>
    %c48_225 = arith.constant 48 : index
    %c32_226 = arith.constant 32 : index
    %143 = vector.load %arg13[%c48_225, %c32_226] : memref<128x64xf32, #tpu.memory_space<vmem>>, vector<8x32xf32>
    tpu.vector_store %arg13[%c48_225, %c32_226], %142 {strides = array<i32>} : memref<128x64xf32, #tpu.memory_space<vmem>>, vector<8x32xf32>,
    %c0_227 = arith.constant 0 : index
    %c7_228 = arith.constant 7 : index
    %144 = vector.load %arg12[%c0_227, %c7_228] : memref<8x47xf32, #tpu.memory_space<vmem>>, vector<8x32xf32>
    %c56_229 = arith.constant 56 : index
    %c32_230 = arith.constant 32 : index
    %145 = vector.load %arg13[%c56_229, %c32_230] : memref<128x64xf32, #tpu.memory_space<vmem>>, vector<8x32xf32>
    tpu.vector_store %arg13[%c56_229, %c32_230], %144 {strides = array<i32>} : memref<128x64xf32, #tpu.memory_space<vmem>>, vector<8x32xf32>,
    %c0_231 = arith.constant 0 : index
    %c8_232 = arith.constant 8 : index
    %146 = vector.load %arg12[%c0_231, %c8_232] : memref<8x47xf32, #tpu.memory_space<vmem>>, vector<8x32xf32>
    %c64_233 = arith.constant 64 : index
    %c32_234 = arith.constant 32 : index
    %147 = vector.load %arg13[%c64_233, %c32_234] : memref<128x64xf32, #tpu.memory_space<vmem>>, vector<8x32xf32>
    tpu.vector_store %arg13[%c64_233, %c32_234], %146 {strides = array<i32>} : memref<128x64xf32, #tpu.memory_space<vmem>>, vector<8x32xf32>,
    %c0_235 = arith.constant 0 : index
    %c9_236 = arith.constant 9 : index
    %148 = vector.load %arg12[%c0_235, %c9_236] : memref<8x47xf32, #tpu.memory_space<vmem>>, vector<8x32xf32>
    %c72_237 = arith.constant 72 : index
    %c32_238 = arith.constant 32 : index
    %149 = vector.load %arg13[%c72_237, %c32_238] : memref<128x64xf32, #tpu.memory_space<vmem>>, vector<8x32xf32>
    tpu.vector_store %arg13[%c72_237, %c32_238], %148 {strides = array<i32>} : memref<128x64xf32, #tpu.memory_space<vmem>>, vector<8x32xf32>,
    %c0_239 = arith.constant 0 : index
    %c10_240 = arith.constant 10 : index
    %150 = vector.load %arg12[%c0_239, %c10_240] : memref<8x47xf32, #tpu.memory_space<vmem>>, vector<8x32xf32>
    %c80_241 = arith.constant 80 : index
    %c32_242 = arith.constant 32 : index
    %151 = vector.load %arg13[%c80_241, %c32_242] : memref<128x64xf32, #tpu.memory_space<vmem>>, vector<8x32xf32>
    tpu.vector_store %arg13[%c80_241, %c32_242], %150 {strides = array<i32>} : memref<128x64xf32, #tpu.memory_space<vmem>>, vector<8x32xf32>,
    %c0_243 = arith.constant 0 : index
    %c11_244 = arith.constant 11 : index
    %152 = vector.load %arg12[%c0_243, %c11_244] : memref<8x47xf32, #tpu.memory_space<vmem>>, vector<8x32xf32>
    %c88_245 = arith.constant 88 : index
    %c32_246 = arith.constant 32 : index
    %153 = vector.load %arg13[%c88_245, %c32_246] : memref<128x64xf32, #tpu.memory_space<vmem>>, vector<8x32xf32>
    tpu.vector_store %arg13[%c88_245, %c32_246], %152 {strides = array<i32>} : memref<128x64xf32, #tpu.memory_space<vmem>>, vector<8x32xf32>,
    %c0_247 = arith.constant 0 : index
    %c12_248 = arith.constant 12 : index
    %154 = vector.load %arg12[%c0_247, %c12_248] : memref<8x47xf32, #tpu.memory_space<vmem>>, vector<8x32xf32>
    %c96_249 = arith.constant 96 : index
    %c32_250 = arith.constant 32 : index
    %155 = vector.load %arg13[%c96_249, %c32_250] : memref<128x64xf32, #tpu.memory_space<vmem>>, vector<8x32xf32>
    tpu.vector_store %arg13[%c96_249, %c32_250], %154 {strides = array<i32>} : memref<128x64xf32, #tpu.memory_space<vmem>>, vector<8x32xf32>,
    %c0_251 = arith.constant 0 : index
    %c13_252 = arith.constant 13 : index
    %156 = vector.load %arg12[%c0_251, %c13_252] : memref<8x47xf32, #tpu.memory_space<vmem>>, vector<8x32xf32>
    %c104_253 = arith.constant 104 : index
    %c32_254 = arith.constant 32 : index
    %157 = vector.load %arg13[%c104_253, %c32_254] : memref<128x64xf32, #tpu.memory_space<vmem>>, vector<8x32xf32>
    tpu.vector_store %arg13[%c104_253, %c32_254], %156 {strides = array<i32>} : memref<128x64xf32, #tpu.memory_space<vmem>>, vector<8x32xf32>,
    %c0_255 = arith.constant 0 : index
    %c14_256 = arith.constant 14 : index
    %158 = vector.load %arg12[%c0_255, %c14_256] : memref<8x47xf32, #tpu.memory_space<vmem>>, vector<8x32xf32>
    %c112_257 = arith.constant 112 : index
    %c32_258 = arith.constant 32 : index
    %159 = vector.load %arg13[%c112_257, %c32_258] : memref<128x64xf32, #tpu.memory_space<vmem>>, vector<8x32xf32>
    tpu.vector_store %arg13[%c112_257, %c32_258], %158 {strides = array<i32>} : memref<128x64xf32, #tpu.memory_space<vmem>>, vector<8x32xf32>,
    %c0_259 = arith.constant 0 : index
    %c15_260 = arith.constant 15 : index
    %160 = vector.load %arg12[%c0_259, %c15_260] : memref<8x47xf32, #tpu.memory_space<vmem>>, vector<8x32xf32>
    %c120_261 = arith.constant 120 : index
    %c32_262 = arith.constant 32 : index
    %161 = vector.load %arg13[%c120_261, %c32_262] : memref<128x64xf32, #tpu.memory_space<vmem>>, vector<8x32xf32>
    tpu.vector_store %arg13[%c120_261, %c32_262], %160 {strides = array<i32>} : memref<128x64xf32, #tpu.memory_space<vmem>>, vector<8x32xf32>,
    %c0_263 = arith.constant 0 : index
    %c0_264 = arith.constant 0 : index
    %162 = vector.load %arg5[%c0_263, %c0_264] : memref<8x128xf32, #tpu.memory_space<vmem>>, vector<8x128xf32>
    %c0_265 = arith.constant 0 : index
    %c0_266 = arith.constant 0 : index
    %163 = vector.load %arg13[%c0_265, %c0_266] : memref<128x64xf32, #tpu.memory_space<vmem>>, vector<128x64xf32>
    %cst_267 = arith.constant dense<0.000000e+00> : vector<8x64xf32>
    %164 = tpu.matmul %162, %163, %cst_267 {dimension_numbers = #tpu.dot_dimension_numbers<[1], [0], [0], [1], [0, 0, 1, 1], [], []>} : vector<8x128xf32>, vector<128x64xf32>, vector<8x64xf32> -> vector<8x64xf32>
    %c0_268 = arith.constant 0 : index
    %c0_269 = arith.constant 0 : index
    %165 = vector.load %arg6[%c0_268, %c0_269] : memref<8x1xf32, #tpu.memory_space<vmem>>, vector<8x1xf32>
    %166 = vector.broadcast %165 : vector<8x1xf32> to vector<8x64xf32>
    %167 = arith.addf %164, %166 : vector<8x64xf32>
    %cst_270 = arith.constant 0.000000e+00 : f32
    %168 = vector.broadcast %cst_270 : f32 to vector<8x64xf32>
    %169 = arith.cmpf ogt, %167, %168 : vector<8x64xf32>
    %cst_271 = arith.constant 0.000000e+00 : f32
    %170 = vector.broadcast %cst_271 : f32 to vector<8x64xf32>
    %171 = arith.minimumf %167, %170 : vector<8x64xf32>
    %172 = math.exp %171 : vector<8x64xf32>
    %cst_272 = arith.constant 1.000000e+00 : f32
    %173 = vector.broadcast %cst_272 : f32 to vector<8x64xf32>
    %174 = arith.subf %172, %173 : vector<8x64xf32>
    %175 = arith.select %169, %167, %174 : vector<8x64xi1>, vector<8x64xf32>
    %176 = vector.extract_strided_slice %175 {offsets = [0, 0], sizes = [8, 32], strides = [1, 1]} : vector<8x64xf32> to vector<8x32xf32>
    %c0_273 = arith.constant 0 : index
    %c0_274 = arith.constant 0 : index
    %c0_275 = arith.constant 0 : index
    %177 = vector.load %arg7[%c0_273, %c0_274, %c0_275] : memref<4x8x32xf32, #tpu.memory_space<vmem>>, vector<4x8x32xf32>
    %178 = vector.shape_cast %176 : vector<8x32xf32> to vector<1x8x32xf32>
    %179 = vector.broadcast %178 : vector<1x8x32xf32> to vector<4x8x32xf32>
    %180 = arith.mulf %177, %179 : vector<4x8x32xf32>
    %cst_276 = arith.constant dense<0.000000e+00> : vector<4x8xf32>
    %181 = vector.multi_reduction <add>, %180, %cst_276 [2] : vector<4x8x32xf32> to vector<4x8xf32>
    %cst_277 = arith.constant dense<0.000000e+00> : vector<4xf32>
    %182 = vector.multi_reduction <add>, %181, %cst_277 [1] : vector<4x8xf32> to vector<4xf32>
    %183 = vector.shape_cast %182 : vector<4xf32> to vector<4x1xf32>
    %c0_278 = arith.constant 0 : index
    %c0_279 = arith.constant 0 : index
    %184 = vector.load %arg8[%c0_278, %c0_279] : memref<4x1xf32, #tpu.memory_space<vmem>>, vector<4x1xf32>
    %185 = arith.addf %183, %184 : vector<4x1xf32>
    %cst_280 = arith.constant dense<0xFF800000> : vector<1xf32>
    %186 = vector.multi_reduction <maximumf>, %185, %cst_280 [0] : vector<4x1xf32> to vector<1xf32>
    %187 = vector.shape_cast %186 : vector<1xf32> to vector<1x1xf32>
    %188 = vector.broadcast %187 : vector<1x1xf32> to vector<4x1xf32>
    %189 = arith.subf %185, %188 : vector<4x1xf32>
    %190 = math.exp %189 : vector<4x1xf32>
    %cst_281 = arith.constant dense<0.000000e+00> : vector<1xf32>
    %191 = vector.multi_reduction <add>, %190, %cst_281 [0] : vector<4x1xf32> to vector<1xf32>
    %192 = vector.shape_cast %191 : vector<1xf32> to vector<1x1xf32>
    %193 = vector.broadcast %192 : vector<1x1xf32> to vector<4x1xf32>
    %194 = arith.divf %190, %193 : vector<4x1xf32>
    %c0_282 = arith.constant 0 : index
    %c0_283 = arith.constant 0 : index
    %195 = vector.load %arg9[%c0_282, %c0_283] : memref<4x2xf32, #tpu.memory_space<vmem>>, vector<4x1xf32>
    tpu.vector_store %arg9[%c0_282, %c0_283], %194 {strides = array<i32>} : memref<4x2xf32, #tpu.memory_space<vmem>>, vector<4x1xf32>,
    %196 = vector.extract_strided_slice %175 {offsets = [0, 32], sizes = [8, 32], strides = [1, 1]} : vector<8x64xf32> to vector<8x32xf32>
    %c0_284 = arith.constant 0 : index
    %c0_285 = arith.constant 0 : index
    %c0_286 = arith.constant 0 : index
    %197 = vector.load %arg7[%c0_284, %c0_285, %c0_286] : memref<4x8x32xf32, #tpu.memory_space<vmem>>, vector<4x8x32xf32>
    %198 = vector.shape_cast %196 : vector<8x32xf32> to vector<1x8x32xf32>
    %199 = vector.broadcast %198 : vector<1x8x32xf32> to vector<4x8x32xf32>
    %200 = arith.mulf %197, %199 : vector<4x8x32xf32>
    %cst_287 = arith.constant dense<0.000000e+00> : vector<4x8xf32>
    %201 = vector.multi_reduction <add>, %200, %cst_287 [2] : vector<4x8x32xf32> to vector<4x8xf32>
    %cst_288 = arith.constant dense<0.000000e+00> : vector<4xf32>
    %202 = vector.multi_reduction <add>, %201, %cst_288 [1] : vector<4x8xf32> to vector<4xf32>
    %203 = vector.shape_cast %202 : vector<4xf32> to vector<4x1xf32>
    %c0_289 = arith.constant 0 : index
    %c0_290 = arith.constant 0 : index
    %204 = vector.load %arg8[%c0_289, %c0_290] : memref<4x1xf32, #tpu.memory_space<vmem>>, vector<4x1xf32>
    %205 = arith.addf %203, %204 : vector<4x1xf32>
    %cst_291 = arith.constant dense<0xFF800000> : vector<1xf32>
    %206 = vector.multi_reduction <maximumf>, %205, %cst_291 [0] : vector<4x1xf32> to vector<1xf32>
    %207 = vector.shape_cast %206 : vector<1xf32> to vector<1x1xf32>
    %208 = vector.broadcast %207 : vector<1x1xf32> to vector<4x1xf32>
    %209 = arith.subf %205, %208 : vector<4x1xf32>
    %210 = math.exp %209 : vector<4x1xf32>
    %cst_292 = arith.constant dense<0.000000e+00> : vector<1xf32>
    %211 = vector.multi_reduction <add>, %210, %cst_292 [0] : vector<4x1xf32> to vector<1xf32>
    %212 = vector.shape_cast %211 : vector<1xf32> to vector<1x1xf32>
    %213 = vector.broadcast %212 : vector<1x1xf32> to vector<4x1xf32>
    %214 = arith.divf %210, %213 : vector<4x1xf32>
    %c0_293 = arith.constant 0 : index
    %c1_294 = arith.constant 1 : index
    %215 = vector.load %arg9[%c0_293, %c1_294] : memref<4x2xf32, #tpu.memory_space<vmem>>, vector<4x1xf32>
    tpu.vector_store %arg9[%c0_293, %c1_294], %214 {strides = array<i32>} : memref<4x2xf32, #tpu.memory_space<vmem>>, vector<4x1xf32>,
    return
  }
  func.func @transform_0(%arg0: i32) -> (i32, i32, i32, i32) {
    %c0_i32 = arith.constant 0 : i32
    %c0_i32_0 = arith.constant 0 : i32
    %c0_i32_1 = arith.constant 0 : i32
    %c0_i32_2 = arith.constant 0 : i32
    return %arg0, %c0_i32, %c0_i32_0, %c0_i32_1 : i32, i32, i32, i32
  }
  func.func @transform_1(%arg0: i32) -> (i32, i32) {
    %c0_i32 = arith.constant 0 : i32
    %c0_i32_0 = arith.constant 0 : i32
    %c0_i32_1 = arith.constant 0 : i32
    return %c0_i32, %c0_i32_0 : i32, i32
  }
  func.func @transform_2(%arg0: i32) -> (i32, i32) {
    %c0_i32 = arith.constant 0 : i32
    %c0_i32_0 = arith.constant 0 : i32
    %c0_i32_1 = arith.constant 0 : i32
    return %c0_i32, %c0_i32_0 : i32, i32
  }
  func.func @transform_3(%arg0: i32) -> (i32, i32) {
    %c0_i32 = arith.constant 0 : i32
    %c0_i32_0 = arith.constant 0 : i32
    %c0_i32_1 = arith.constant 0 : i32
    return %c0_i32, %c0_i32_0 : i32, i32
  }
  func.func @transform_4(%arg0: i32) -> (i32, i32) {
    %c0_i32 = arith.constant 0 : i32
    %c0_i32_0 = arith.constant 0 : i32
    %c0_i32_1 = arith.constant 0 : i32
    return %c0_i32, %c0_i32_0 : i32, i32
  }
  func.func @transform_5(%arg0: i32) -> (i32, i32) {
    %c0_i32 = arith.constant 0 : i32
    %c0_i32_0 = arith.constant 0 : i32
    %c0_i32_1 = arith.constant 0 : i32
    return %c0_i32, %c0_i32_0 : i32, i32
  }
  func.func @transform_6(%arg0: i32) -> (i32, i32, i32) {
    %c0_i32 = arith.constant 0 : i32
    %c0_i32_0 = arith.constant 0 : i32
    %c0_i32_1 = arith.constant 0 : i32
    %c0_i32_2 = arith.constant 0 : i32
    return %c0_i32, %c0_i32_0, %c0_i32_1 : i32, i32, i32
  }
  func.func @transform_7(%arg0: i32) -> (i32, i32) {
    %c0_i32 = arith.constant 0 : i32
    %c0_i32_0 = arith.constant 0 : i32
    %c0_i32_1 = arith.constant 0 : i32
    return %c0_i32, %c0_i32_0 : i32, i32
  }
  func.func @transform_8(%arg0: i32) -> (i32, i32) {
    %c0_i32 = arith.constant 0 : i32
    %c0_i32_0 = arith.constant 0 : i32
    return %c0_i32, %arg0 : i32, i32
  }
}

</mosaic_0001>

<bundles_post_ra>
// kernel: eegnet_ssvep_forward.1
= control target key start
LH: loop header
LB: loop body
LE: loop exit
PB: predicated region body
PF: predicated region fallthrough
CT: control target
= control target key end

     0   :  { %vm29_vm0 = vcmask 56320   ;;  %vm31_vm1 = vcmask 121912   ;;  %v1466_v1 = vmov 0.0   ;;  %s1467_s29 = smov 7   ;;  %vm41_vm2 = vcmask 1047608   ;;  %s1468_s10 = smov 126   ;;  %s1892_s0 = inlined_call_operand.vmem [shape: f32[2,1,8,128], index: 0, kind: input, shape index: {}]   ;;  %s1893_s2 = inlined_call_operand.vmem [shape: f32[8,1], index: 2, kind: input, shape index: {}]   ;;  %s1894_s3 = inlined_call_operand.vmem [shape: f32[256,64], index: 3, kind: input, shape index: {}]   ;;  %s1895_s1 = inlined_call_operand.vmem [shape: f32[8,128], index: 1, kind: input, shape index: {}]   ;;  %s1896_s5 = inlined_call_operand.vmem [shape: f32[8,1], index: 5, kind: input, shape index: {}]   ;;  %s1897_s4 = inlined_call_operand.vmem [shape: f32[8,128], index: 4, kind: input, shape index: {}]   ;;  %s1898_s6 = inlined_call_operand.vmem [shape: f32[4,8,32], index: 6, kind: input, shape index: {}]   ;;  %s1899_s7 = inlined_call_operand.vmem [shape: f32[4,1], index: 7, kind: input, shape index: {}]   ;;  %s1900_s8 = inlined_call_operand.vmem [shape: f32[4,2], index: 8, kind: output, shape index: {}]  }
   0x1   :  { %v36_v0 = vld [vmem:[%s1892_s0] sm:$0xff]  ;;  %30 = vst.msk [vmem:[#allocation2] sm:$0xff] %vm29_vm0, %v1466_v1  ;;  %33 = vst.msk [vmem:[#allocation4] sm:$0xff] %vm29_vm0, %v1466_v1  ;;  %504 = vmatprep.mubr.f32.mxu0 %v1466_v1  ;;  %v1082_v2 = vld [vmem:[%s1892_s0 + $0x8] sm:$0xff]  ;;  %s1469_s0 = smov 127   ;;  %s1470_s11 = smov 124  }
   0x2   :  { %32 = vst.msk [vmem:[#allocation2 + $0x8] sm:$0xff] %vm31_vm1, %v1466_v1  ;;  %38 = vrot.lane.b32.xlu0 %v36_v0, %s1467_s29  ;;  %s1471_s12 = smov 125   ;;  %s1472_s13 = smov 122   ;;  %v1483_v11 = vmov 0   ;;  %v434_v12 = vld [vmem:[%s1893_s2] sm:$0xff]  ;;  %v540_v14 = vld [vmem:[%s1894_s3 + $0x88] sm:$0xff] }
   0x3   :  { %s1473_s14 = smov 123   ;;  %s1474_s15 = smov 120   ;;  %1450 = vset.pattern.permute.xlu0 %v1483_v11  ;;  %v539_v13 = vld [vmem:[%s1894_s3 + $0x80] sm:$0xff]  ;;  %v524_v17 = vld [vmem:[%s1894_s3 + $0x8] sm:$0xff]  ;;  %v541_v18 = vld [vmem:[%s1894_s3 + $0x90] sm:$0xff]  ;;  %1451 = vset.pattern.permute.xlu1 %v1483_v11  ;;  %vm54_vm3 = vcmask 1039360  }
   0x4   :  { %s1475_s16 = smov 121   ;;  %s1476_s17 = smov 118   ;;  %v1205_v15 = vpack.c.bf16 %v540_v14, %v539_v13  ;;  %v523_v16 = vld [vmem:[%s1894_s3] sm:$0xff]  ;;  %v542_v20 = vld [vmem:[%s1894_s3 + $0x98] sm:$0xff]  ;;  %v525_v21 = vld [vmem:[%s1894_s3 + $0x10] sm:$0xff]  ;;  %vm78_vm4 = vcmask 1022976  }
   0x5   :  { %s1477_s18 = smov 119   ;;  %s1478_s19 = smov 116   ;;  %v1207_v19 = vpack.c.bf16 %v524_v17, %v523_v16  ;;  %v526_v22 = vld [vmem:[%s1894_s3 + $0x18] sm:$0xff]  ;;  %v1209_v23 = vpack.c.bf16 %v542_v20, %v541_v18  ;;  %v543_v24 = vld [vmem:[%s1894_s3 + $0xa0] sm:$0xff]  ;;  %v544_v25 = vld [vmem:[%s1894_s3 + $0xa8] sm:$0xff]  ;;  %vm66_vm5 = vcmask 1031168  }
   0x6   :  { %229 = vrot.lane.b32.xlu0 %v1082_v2, %s1467_s29  ;;  %s1903_s20 = smov 117   ;;  %s1901_s21 = smov 115   ;;  %1206 = vmatprep.subr.bf16.mxu1 %v1205_v15  ;;  %v1211_v26 = vpack.c.bf16 %v526_v22, %v525_v21  ;;  %v1213_v27 = vpack.c.bf16 %v544_v25, %v543_v24  ;;  %v527_v28 = vld [vmem:[%s1894_s3 + $0x20] sm:$0xff]  ;;  %v528_v29 = vld [vmem:[%s1894_s3 + $0x28] sm:$0xff]  ;;  %vm102_vm6 = vcmask 1006592   ;;  %vm90_vm7 = vcmask 1014784  }
   0x7   :  { %s1902_s22 = smov 114   ;;  %s1482_s23 = smov 113   ;;  %1208 = vmatpush3.bf16.msra.mxu1 %v1207_v19  ;;  %v1215_v30 = vpack.c.bf16 %v528_v29, %v527_v28  ;;  %vm126_vm8 = vcmask 990208   ;;  %vm114_vm9 = vcmask 998400   ;;  %vm150_vm10 = vcmask 973824  }
   0x8   :  { %1210 = vmatprep.subr.bf16.mxu1 %v1209_v23  ;;  %vm138_vm11 = vcmask 982016   ;;  %vm174_vm12 = vcmask 957440   ;;  %vm162_vm13 = vcmask 965632   ;;  %vm198_vm14 = vcmask 941056   ;;  %s1496_s24 = smov 22   ;;  %s1497_s2 = smov 21  }
   0x9   :  { %vm186_vm15 = vcmask 949248   ;;  %vm222_vm1 = vcmask 924672   ;;  %s1498_s25 = smov 20   ;;  %s1499_s26 = smov 19  }
   0xa   :  { %s1502_s27 = smov 17  }
   0xb   :  { %1212 = vmatpush3.bf16.msra.mxu1 %v1211_v26 }
   0xc   :  { %1214 = vmatprep.subr.bf16.mxu1 %v1213_v27 }
   0xf   :  { %1216 = vmatpush3.bf16.msra.mxu1 %v1215_v30 }
  0x74   :  { %v39_v3 = vpop.permute.xlu0 %38 }
  0x75   :  { %42 = vst.msk [vmem:[#allocation2] sm:$0xff] %vm41_vm2, %v39_v3 }
  0x76   :  { %43 = vst.msk [vmem:[#allocation2 + $0x8] sm:$0xff] %vm29_vm0, %v39_v3 }
  0x78   :  { %v230_v4 = vpop.permute.xlu0 %229 }
  0x7c   :  { %v1565_v5 = vld [vmem:[#allocation2] sm:$0xff] }
  0x7d   :  { %v203_v6 = vld [vmem:[#allocation2 + $0x8] sm:$0xff]  ;;  %232 = vst.msk [vmem:[#allocation2] sm:$0xff] %vm41_vm2, %v230_v4 }
  0x7e   :  { %v1568_v7 = vpack.i.bf16 %v203_v6, %v1565_v5  ;;  %233 = vst.msk [vmem:[#allocation2 + $0x8] sm:$0xff] %vm29_vm0, %v230_v4  ;;  %vm210_vm0 = vcmask 932864  }
  0x80   :  { %1306 = vrot.lane.b32.xlu0 %v1568_v7, %s1468_s10  ;;  %1301 = vrot.lane.b32.xlu1 %v1568_v7, %s1469_s0 }
  0x84   :  { %1316 = vrot.lane.b32.xlu0 %v1568_v7, %s1470_s11  ;;  %1311 = vrot.lane.b32.xlu1 %v1568_v7, %s1471_s12  ;;  %v1591_v8 = vld [vmem:[#allocation2] sm:$0xff] }
  0x85   :  { %v248_v9 = vld [vmem:[#allocation2 + $0x8] sm:$0xff] }
  0x86   :  { %v1370_v10 = vpack.i.bf16 %v248_v9, %v1591_v8 }
  0x88   :  { %1326 = vrot.lane.b32.xlu0 %v1568_v7, %s1472_s13  ;;  %1321 = vrot.lane.b32.xlu1 %v1568_v7, %s1473_s14 }
  0x8c   :  { %1336 = vrot.lane.b32.xlu0 %v1568_v7, %s1474_s15  ;;  %1331 = vrot.lane.b32.xlu1 %v1568_v7, %s1475_s16 }
  0x90   :  { %1346 = vrot.lane.b32.xlu0 %v1568_v7, %s1476_s17  ;;  %1341 = vrot.lane.b32.xlu1 %v1568_v7, %s1477_s18 }
  0x94   :  { %1356 = vrot.lane.b32.xlu0 %v1568_v7, %s1478_s19  ;;  %1351 = vrot.lane.b32.xlu1 %v1568_v7, %s1903_s20 }
  0x98   :  { %1361 = vrot.lane.b32.xlu1 %v1568_v7, %s1901_s21  ;;  %1371 = vrot.lane.b32.xlu0 %v1370_v10, %s1468_s10 }
  0x9c   :  { %1381 = vrot.lane.b32.xlu0 %v1370_v10, %s1470_s11  ;;  %1366 = vrot.lane.b32.xlu1 %v1370_v10, %s1469_s0 }
  0xa0   :  { %1391 = vrot.lane.b32.xlu0 %v1370_v10, %s1472_s13  ;;  %1376 = vrot.lane.b32.xlu1 %v1370_v10, %s1471_s12 }
  0xa4   :  { %1401 = vrot.lane.b32.xlu0 %v1370_v10, %s1474_s15  ;;  %1386 = vrot.lane.b32.xlu1 %v1370_v10, %s1473_s14 }
  0xa8   :  { %1411 = vrot.lane.b32.xlu0 %v1370_v10, %s1476_s17  ;;  %1396 = vrot.lane.b32.xlu1 %v1370_v10, %s1475_s16 }
  0xac   :  { %1421 = vrot.lane.b32.xlu0 %v1370_v10, %s1478_s19  ;;  %1406 = vrot.lane.b32.xlu1 %v1370_v10, %s1477_s18 }
  0xb0   :  { %1431 = vrot.lane.b32.xlu0 %v1370_v10, %s1902_s22  ;;  %1416 = vrot.lane.b32.xlu1 %v1370_v10, %s1903_s20  ;;  %s1503_s20 = smov 96  }
  0xb4   :  { %1436 = vrot.lane.b32.xlu0 %v1568_v7, %s1902_s22  ;;  %1426 = vrot.lane.b32.xlu1 %v1370_v10, %s1901_s21 }
  0xb8   :  { %1441 = vrot.lane.b32.xlu1 %v1370_v10, %s1482_s23  ;;  %437 = vperm.xlu0 %1450, %v434_v12  }
  0xbc   :  { %1446 = vrot.lane.b32.xlu1 %v1568_v7, %s1482_s23 }
  0xf2   :  { %v1302_v31 = vpop.permute.xlu1 %1301  ;;  %v1307_v32 = vpop.permute.xlu0 %1306 }
  0xf3   :  { %v1304_v45 = vunpack.i.h.bf16 %v1302_v31  ;;  %v1303_v46 = vunpack.i.l.bf16 %v1302_v31  ;;  %v1309_v57 = vunpack.i.h.bf16 %v1307_v32  ;;  %v1308_v58 = vunpack.i.l.bf16 %v1307_v32 }
  0xf5   :  { %v55_v53 = vsel %vm54_vm3, %v1303_v46, %v1304_v45  ;;  %v67_v14 = vsel %vm66_vm5, %v1308_v58, %v1309_v57 }
  0xf6   :  { %v1312_v33 = vpop.permute.xlu1 %1311  ;;  %v1658_v34 = vpop.permute.xlu0 %1316  ;;  %v1175_v0 = vpack.c.bf16 %v55_v53, %v1565_v5 }
  0xf7   :  { %v1314_v51 = vunpack.i.h.bf16 %v1312_v33  ;;  %v1313_v52 = vunpack.i.l.bf16 %v1312_v33  ;;  %v1318_v11 = vunpack.i.l.bf16 %v1658_v34 }
  0xf9   :  { %v79_v4 = vsel %vm78_vm4, %v1313_v52, %v1314_v51 }
  0xfa   :  { %v1322_v35 = vpop.permute.xlu1 %1321  ;;  %v1660_v36 = vpop.permute.xlu0 %1326  ;;  %v1179_v17 = vpack.c.bf16 %v79_v4, %v67_v14 }
  0xfb   :  { %v1324_v2 = vunpack.i.h.bf16 %v1322_v35  ;;  %v1323_v3 = vunpack.i.l.bf16 %v1322_v35  ;;  %v1329_v25 = vunpack.i.h.bf16 %v1660_v36  ;;  %v1328_v26 = vunpack.i.l.bf16 %v1660_v36 }
  0xfd   :  { %v103_v20 = vsel %vm102_vm6, %v1323_v3, %v1324_v2 }
  0xfe   :  { %v1662_v37 = vpop.permute.xlu1 %1331  ;;  %v1664_v38 = vpop.permute.xlu0 %1336 }
  0xff   :  { %v1334_v18 = vunpack.i.h.bf16 %v1662_v37  ;;  %v1333_v19 = vunpack.i.l.bf16 %v1662_v37 }
 0x101   :  { %v127_v37 = vsel %vm126_vm8, %v1333_v19, %v1334_v18 }
 0x102   :  { %v1666_v39 = vpop.permute.xlu1 %1341  ;;  %v1668_v40 = vpop.permute.xlu0 %1346 }
 0x103   :  { %v1343_v35 = vunpack.i.l.bf16 %v1666_v39 }
 0x106   :  { %v1670_v41 = vpop.permute.xlu1 %1351  ;;  %v1672_v42 = vpop.permute.xlu0 %1356 }
 0x10a   :  { %v1674_v43 = vpop.permute.xlu1 %1361  ;;  %v1372_v44 = vpop.permute.xlu0 %1371 }
 0x10b   :  { %v1374_v54 = vunpack.i.h.bf16 %v1372_v44  ;;  %v1373_v55 = vunpack.i.l.bf16 %v1372_v44 }
 0x10d   :  { %v255_v9 = vsel %vm66_vm5, %v1373_v55, %v1374_v54  ;;  %v1354_v55 = vunpack.i.h.bf16 %v1670_v41  ;;  %vm629_vm5 = vcmask 318520  }
 0x10e   :  { %v1367_v47 = vpop.permute.xlu1 %1366  ;;  %v1382_v48 = vpop.permute.xlu0 %1381 }
 0x10f   :  { %v1369_v49 = vunpack.i.h.bf16 %v1367_v47  ;;  %v1368_v50 = vunpack.i.l.bf16 %v1367_v47  ;;  %v1384_v6 = vunpack.i.h.bf16 %v1382_v48  ;;  %v1383_v7 = vunpack.i.l.bf16 %v1382_v48 }
 0x110   :  { %v1339_v47 = vunpack.i.h.bf16 %v1664_v38  ;;  %v1338_v48 = vunpack.i.l.bf16 %v1664_v38 }
 0x111   :  { %v244_v56 = vsel %vm54_vm3, %v1368_v50, %v1369_v49  ;;  %v277_v23 = vsel %vm90_vm7, %v1383_v7, %v1384_v6  ;;  %v1364_v6 = vunpack.i.h.bf16 %v1674_v43  ;;  %v1363_v7 = vunpack.i.l.bf16 %v1674_v43 }
 0x112   :  { %v1377_v59 = vpop.permute.xlu1 %1376  ;;  %v1392_v60 = vpop.permute.xlu0 %1391  ;;  %v1173_v61 = vpack.c.bf16 %v244_v56, %v1591_v8  ;;  %v1319_v8 = vunpack.i.h.bf16 %v1658_v34  ;;  %v1344_v34 = vunpack.i.h.bf16 %v1666_v39  ;;  %v115_v39 = vsel %vm114_vm9, %v1328_v26, %v1329_v25 }
 0x113   :  { %v1379_v62 = vunpack.i.h.bf16 %v1377_v59  ;;  %v1378_v63 = vunpack.i.l.bf16 %v1377_v59  ;;  %v1394_v21 = vunpack.i.h.bf16 %v1392_v60  ;;  %v1393_v22 = vunpack.i.l.bf16 %v1392_v60 }
 0x114   :  { %1174 = vmatprep.subr.bf16.mxu0 %v1173_v61  ;;  %v91_v30 = vsel %vm90_vm7, %v1318_v11, %v1319_v8  ;;  %v1187_v54 = vpack.c.bf16 %v127_v37, %v115_v39  ;;  %v1353_v56 = vunpack.i.l.bf16 %v1670_v41  ;;  %v151_v57 = vsel %vm150_vm10, %v1343_v35, %v1344_v34  ;;  %v530_v39 = vld [vmem:[%s1894_s3 + $0x38] sm:$0xff] }
 0x115   :  { %1176 = vmatpush1.bf16.msra.mxu0 %v1175_v0  ;;  %v266_v10 = vsel %vm78_vm4, %v1378_v63, %v1379_v62  ;;  %v1183_v33 = vpack.c.bf16 %v103_v20, %v91_v30  ;;  %v299_v36 = vsel %vm114_vm9, %v1393_v22, %v1394_v21  ;;  %v1349_v61 = vunpack.i.h.bf16 %v1668_v40 }
 0x116   :  { %v1387_v12 = vpop.permute.xlu1 %1386  ;;  %v1402_v5 = vpop.permute.xlu0 %1401  ;;  %v1177_v13 = vpack.c.bf16 %v266_v10, %v255_v9  ;;  %v1348_v62 = vunpack.i.l.bf16 %v1668_v40  ;;  %v139_v2 = vsel %vm138_vm11, %v1338_v48, %v1339_v47  ;;  %v175_v10 = vsel %vm174_vm12, %v1353_v56, %v1354_v55  ;;  %v401_v47 = vld [vmem:[%s1895_s1] sm:$0xff]  ;;  %v545_v48 = vld [vmem:[%s1894_s3 + $0xb0] sm:$0xff]  ;;  %s1500_s1 = smov 18  }
 0x117   :  { %v1389_v15 = vunpack.i.h.bf16 %v1387_v12  ;;  %v1388_v16 = vunpack.i.l.bf16 %v1387_v12  ;;  %v1404_v44 = vunpack.i.h.bf16 %v1402_v5  ;;  %v1403_v45 = vunpack.i.l.bf16 %v1402_v5  ;;  %v531_v56 = vld [vmem:[%s1894_s3 + $0x40] sm:$0xff] }
 0x118   :  { %1178 = vmatprep.subr.bf16.mxu0 %v1177_v13  ;;  %v1191_v41 = vpack.c.bf16 %v151_v57, %v139_v2  ;;  %v1359_v5 = vunpack.i.h.bf16 %v1672_v42  ;;  %v1358_v13 = vunpack.i.l.bf16 %v1672_v42  ;;  %v163_v43 = vsel %vm162_vm13, %v1348_v62, %v1349_v61  ;;  %v532_v57 = vld [vmem:[%s1894_s3 + $0x48] sm:$0xff]  ;;  %v534_v62 = vld [vmem:[%s1894_s3 + $0x58] sm:$0xff] }
 0x119   :  { %1180 = vmatpush1.bf16.msra.mxu0 %v1179_v17  ;;  %v288_v24 = vsel %vm102_vm6, %v1388_v16, %v1389_v15  ;;  %v321_v38 = vsel %vm138_vm11, %v1403_v45, %v1404_v44  ;;  %v1195_v18 = vpack.c.bf16 %v175_v10, %v163_v43  ;;  %v199_v19 = vsel %vm198_vm14, %v1363_v7, %v1364_v6  ;;  %v553_v6 = vld [vmem:[%s1894_s3 + $0xf0] sm:$0xff]  ;;  %v554_v7 = vld [vmem:[%s1894_s3 + $0xf8] sm:$0xff] }
 0x11a   :  { %v1397_v27 = vpop.permute.xlu1 %1396  ;;  %v1412_v28 = vpop.permute.xlu0 %1411  ;;  %v1181_v29 = vpack.c.bf16 %v288_v24, %v277_v23  ;;  %v187_v26 = vsel %vm186_vm15, %v1358_v13, %v1359_v5  ;;  %v1233_v10 = vpack.c.bf16 %v554_v7, %v553_v6  ;;  %vm34_vm4 = vcmask 384312  }
 0x11b   :  { %v1399_v31 = vunpack.i.h.bf16 %v1397_v27  ;;  %v1398_v32 = vunpack.i.l.bf16 %v1397_v27  ;;  %v1414_v58 = vunpack.i.h.bf16 %v1412_v28  ;;  %v1413_v59 = vunpack.i.l.bf16 %v1412_v28  ;;  %35 = vst.msk [vmem:[#allocation4] sm:$0xff] %vm34_vm4, %v1466_v1 }
 0x11c   :  { %1182 = vmatprep.subr.bf16.mxu0 %v1181_v29  ;;  %v1199_v29 = vpack.c.bf16 %v199_v19, %v187_v26  ;;  %vm632_vm6 = vcmask 261120   ;;  %vm1501_vm7 = vmmov 0   ;;  %vm968_vm11 = vcmask 1042434  }
 0x11d   :  { %1184 = vmatpush1.bf16.msra.mxu0 %v1183_v33  ;;  %v310_v46 = vsel %vm126_vm8, %v1398_v32, %v1399_v31  ;;  %v343_v40 = vsel %vm162_vm13, %v1413_v59, %v1414_v58  ;;  %v1223_v58 = vpack.c.bf16 %v532_v57, %v531_v56  ;;  %v549_v59 = vld [vmem:[%s1894_s3 + $0xd0] sm:$0xff]  ;;  %vm733_vm8 = vcmask 523520  }
 0x11e   :  { %v1407_v49 = vpop.permute.xlu1 %1406  ;;  %v1422_v50 = vpop.permute.xlu0 %1421  ;;  %v1185_v51 = vpack.c.bf16 %v310_v46, %v299_v36  ;;  %vm973_vm13 = vcmask 60416  }
 0x11f   :  { %v1409_v52 = vunpack.i.h.bf16 %v1407_v49  ;;  %v1408_v53 = vunpack.i.l.bf16 %v1407_v49  ;;  %v1424_v8 = vunpack.i.h.bf16 %v1422_v50  ;;  %v1423_v11 = vunpack.i.l.bf16 %v1422_v50  ;;  %v546_v49 = vld [vmem:[%s1894_s3 + $0xb8] sm:$0xff] }
 0x120   :  { %1186 = vmatprep.subr.bf16.mxu0 %v1185_v51  ;;  %v1217_v50 = vpack.c.bf16 %v546_v49, %v545_v48  ;;  %v529_v51 = vld [vmem:[%s1894_s3 + $0x30] sm:$0xff] }
 0x121   :  { %1188 = vmatpush1.bf16.msra.mxu0 %v1187_v54  ;;  %v332_v60 = vsel %vm150_vm10, %v1408_v53, %v1409_v52  ;;  %v365_v22 = vsel %vm186_vm15, %v1423_v11, %v1424_v8  ;;  %v1219_v52 = vpack.c.bf16 %v530_v39, %v529_v51  ;;  %v547_v53 = vld [vmem:[%s1894_s3 + $0xc0] sm:$0xff]  ;;  %v548_v54 = vld [vmem:[%s1894_s3 + $0xc8] sm:$0xff]  ;;  %v537_v8 = vld [vmem:[%s1894_s3 + $0x70] sm:$0xff]  ;;  %vm966_vm10 = vcmask 1041409  }
 0x122   :  { %v1417_v63 = vpop.permute.xlu1 %1416  ;;  %v1189_v0 = vpack.c.bf16 %v332_v60, %v321_v38  ;;  %v1432_v9 = vpop.permute.xlu0 %1431  ;;  %1218 = vmatprep.subr.bf16.mxu1 %v1217_v50  ;;  %v1221_v55 = vpack.c.bf16 %v548_v54, %v547_v53  ;;  %v550_v38 = vld [vmem:[%s1894_s3 + $0xd8] sm:$0xff]  ;;  %v533_v60 = vld [vmem:[%s1894_s3 + $0x50] sm:$0xff]  ;;  %vm1076_vm15 = vcmask 11272  }
 0x123   :  { %v1419_v3 = vunpack.i.h.bf16 %v1417_v63  ;;  %v1418_v4 = vunpack.i.l.bf16 %v1417_v63  ;;  %v1434_v20 = vunpack.i.h.bf16 %v1432_v9  ;;  %v1433_v21 = vunpack.i.l.bf16 %v1432_v9  ;;  %1220 = vmatpush3.bf16.msra.mxu1 %v1219_v52  ;;  %v551_v63 = vld [vmem:[%s1894_s3 + $0xe0] sm:$0xff]  ;;  %v538_v11 = vld [vmem:[%s1894_s3 + $0x78] sm:$0xff] }
 0x124   :  { %1190 = vmatprep.subr.bf16.mxu0 %v1189_v0  ;;  %1222 = vmatprep.subr.bf16.mxu1 %v1221_v55  ;;  %v1225_v61 = vpack.c.bf16 %v550_v38, %v549_v59  ;;  %v552_v0 = vld [vmem:[%s1894_s3 + $0xe8] sm:$0xff]  ;;  %v1227_v2 = vpack.c.bf16 %v534_v62, %v533_v60 }
 0x125   :  { %1192 = vmatpush1.bf16.msra.mxu0 %v1191_v41  ;;  %v354_v12 = vsel %vm174_vm12, %v1418_v4, %v1419_v3  ;;  %v387_v32 = vsel %vm210_vm0, %v1433_v21, %v1434_v20  ;;  %v1229_v3 = vpack.c.bf16 %v552_v0, %v551_v63  ;;  %v535_v4 = vld [vmem:[%s1894_s3 + $0x60] sm:$0xff]  ;;  %v536_v41 = vld [vmem:[%s1894_s3 + $0x68] sm:$0xff]  ;;  %s1484_s3 = smov 103   ;;  %vm970_vm12 = vcmask 1043459  }
 0x126   :  { %v1427_v14 = vpop.permute.xlu1 %1426  ;;  %v1193_v15 = vpack.c.bf16 %v354_v12, %v343_v40  ;;  %v1437_v24 = vpop.permute.xlu0 %1436  ;;  %v1231_v9 = vpack.c.bf16 %v536_v41, %v535_v4  ;;  %v1235_v40 = vpack.c.bf16 %v538_v11, %v537_v8 }
 0x127   :  { %v1429_v16 = vunpack.i.h.bf16 %v1427_v14  ;;  %v1428_v17 = vunpack.i.l.bf16 %v1427_v14  ;;  %v1439_v30 = vunpack.i.h.bf16 %v1437_v24  ;;  %v1438_v31 = vunpack.i.l.bf16 %v1437_v24  ;;  %1224 = vmatpush3.bf16.msra.mxu1 %v1223_v58 }
 0x128   :  { %1194 = vmatprep.subr.bf16.mxu0 %v1193_v15  ;;  %1226 = vmatprep.subr.bf16.mxu1 %v1225_v61 }
 0x129   :  { %1196 = vmatpush1.bf16.msra.mxu0 %v1195_v18  ;;  %v376_v23 = vsel %vm198_vm14, %v1428_v17, %v1429_v16  ;;  %v211_v45 = vsel %vm210_vm0, %v1438_v31, %v1439_v30  ;;  %v1486_v31 = vmov 0.0|0.0   ;;  %vm979_vm14 = vcmask 3072  }
 0x12a   :  { %v1442_v25 = vpop.permute.xlu1 %1441  ;;  %v1197_v42 = vpack.c.bf16 %v376_v23, %v365_v22 }
 0x12b   :  { %v1444_v27 = vunpack.i.h.bf16 %v1442_v25  ;;  %v1443_v28 = vunpack.i.l.bf16 %v1442_v25  ;;  %1228 = vmatpush3.bf16.msra.mxu1 %v1227_v2 }
 0x12c   :  { %1198 = vmatprep.subr.bf16.mxu0 %v1197_v42  ;;  %1230 = vmatprep.subr.bf16.mxu1 %v1229_v3 }
 0x12d   :  { %1200 = vmatpush1.bf16.msra.mxu0 %v1199_v29  ;;  %v398_v33 = vsel %vm222_vm1, %v1443_v28, %v1444_v27 }
 0x12e   :  { %v1447_v34 = vpop.permute.xlu1 %1446  ;;  %v1201_v35 = vpack.c.bf16 %v398_v33, %v387_v32  ;;  %v842_v32 = vld [vmem:[%s1896_s5] sm:$0xff] }
 0x12f   :  { %v1449_v37 = vunpack.i.h.bf16 %v1447_v34  ;;  %v1448_v44 = vunpack.i.l.bf16 %v1447_v34  ;;  %1232 = vmatpush3.bf16.msra.mxu1 %v1231_v9 }
 0x130   :  { %1202 = vmatprep.subr.bf16.mxu0 %v1201_v35  ;;  %1234 = vmatprep.subr.bf16.mxu1 %v1233_v10 }
 0x131   :  { %v223_v36 = vsel %vm222_vm1, %v1448_v44, %v1449_v37 }
 0x132   :  { %v1203_v46 = vpack.c.bf16 %v223_v36, %v211_v45 }
 0x133   :  { %1236 = vmatpush3.bf16.msra.mxu1 %v1235_v40 }
 0x134   :  { %1204 = vmatpush1.bf16.msra.mxu0 %v1203_v46 }
 0x135   :  { %1237 = vmatprep.subr.bf16.mxu0 %v1486_v31 }
 0x137   :  { %505 = vmatmul.mubr.f32.vlgmr.msra.gmra.mrb[0].mxu0 %v401_v47  ;;  %v438_v12 = vpop.permute.xlu0 %437 }
 0x138   :  { %1170 = vmatprep.mubr.msk.f32.mxu0 %vm1501_vm7, %v1466_v1 }
 0x20a   :  { %v506_v5 = vpop.f32.mrb[0].mxu0 }
 0x20b   :  { %v507_v13 = vadd.f32 %v506_v5, %v438_v12  ;;  %v508_v14 = vpop.f32.mrb[1].mxu0 }
 0x20c   :  { %v509_v15 = vadd.f32 %v508_v14, %v438_v12 }
 0x20d   :  { %v513_v43 = vmin.f32 %v507_v13, 0.0  ;;  %vm511_vm3 = vcmp.gt.f32.partialorder %v507_v13, 0.0 }
 0x20e   :  { %v514_v16 = vmin.f32 %v509_v15, 0.0  ;;  %vm512_vm2 = vcmp.gt.f32.partialorder %v509_v15, 0.0 }
 0x20f   :  { %v515_v17 = vmul.f32 1.442695, %v513_v43 }
 0x210   :  { %v517_v18 = vmul.f32 1.442695, %v514_v16 }
 0x211   :  { %1452 = vpow2.f32 %v515_v17 }
 0x212   :  { %1454 = vpow2.f32 %v517_v18 }
 0x21b   :  { %v1453_v19 = vpop.eup %1452 }
 0x21c   :  { %v1455_v20 = vpop.eup %1454  ;;  %v1083_v21 = vadd.f32 -1.0, %v1453_v19 }
 0x21d   :  { %v1084_v22 = vadd.f32 -1.0, %v1455_v20 }
 0x21e   :  { %v521_v24 = vsel %vm511_vm3, %v507_v13, %v1083_v21 }
 0x21f   :  { %v522_v23 = vsel %vm512_vm2, %v509_v15, %v1084_v22 }
 0x220   :  { %619 = vmatprep.mubr.f32.mxu1 %v522_v23 }
 0x221   :  { %620 = vmatmul.mubr.f32.vlgmr.msra.gmra.mrb[0].mxu1 %v521_v24 }
 0x2f4   :  { %v1118_v25 = vpop.f32.mrb[0].mxu1 }
 0x2f5   :  { %v1119_v42 = vpop.f32.mrb[1].mxu1 }
 0x2f6   :  { %v1120_v26 = vadd.f32 %v1119_v42, %v1118_v25  ;;  %v825_v25 = vld [vmem:[%s1897_s4] sm:$0xff] }
 0x2f8   :  { %626 = vrot.lane.b32.xlu1 %v1120_v26, %s1467_s29  ;;  %s1904_s29 = smov 117  }
 0x2fc   :  { %724 = vrot.lane.b32.xlu1 %v1120_v26, %s1484_s3 }
 0x36a   :  { %v627_v27 = vpop.permute.xlu1 %626 }
 0x36b   :  { %630 = vst.msk [vmem:[#allocation4] sm:$0xff] %vm629_vm5, %v627_v27 }
 0x36e   :  { %v725_v29 = vpop.permute.xlu1 %724 }
 0x372   :  { %v631_v28 = vld [vmem:[#allocation4] sm:$0xff] }
 0x373   :  { %642 = vrot.lane.b32.xlu1 %v631_v28, %s1468_s10  ;;  %636 = vrot.lane.b32.xlu0 %v631_v28, %s1469_s0  ;;  %727 = vst.msk [vmem:[#allocation4] sm:$0xff] %vm629_vm5, %v725_v29  ;;  %s1905_s10 = smov 114   ;;  %s1906_s0 = smov 115  }
 0x374   :  { %633 = vst.msk [vmem:[#allocation5] sm:$0xff] %vm632_vm6, %v631_v28 }
 0x377   :  { %654 = vrot.lane.b32.xlu1 %v631_v28, %s1470_s11  ;;  %648 = vrot.lane.b32.xlu0 %v631_v28, %s1471_s12  ;;  %s1485_s11 = smov 32   ;;  %s1487_s12 = smov 31  }
 0x37a   :  { %v728_v30 = vld [vmem:[#allocation4] sm:$0xff] }
 0x37b   :  { %666 = vrot.lane.b32.xlu1 %v631_v28, %s1472_s13  ;;  %660 = vrot.lane.b32.xlu0 %v631_v28, %s1473_s14  ;;  %s1488_s13 = smov 30   ;;  %s1489_s14 = smov 29  }
 0x37f   :  { %678 = vrot.lane.b32.xlu1 %v631_v28, %s1474_s15  ;;  %672 = vrot.lane.b32.xlu0 %v631_v28, %s1475_s16  ;;  %s1490_s15 = smov 28   ;;  %s1491_s16 = smov 27  }
 0x383   :  { %690 = vrot.lane.b32.xlu1 %v631_v28, %s1476_s17  ;;  %684 = vrot.lane.b32.xlu0 %v631_v28, %s1477_s18  ;;  %s1492_s17 = smov 26   ;;  %s1493_s18 = smov 25  }
 0x387   :  { %702 = vrot.lane.b32.xlu1 %v631_v28, %s1478_s19  ;;  %696 = vrot.lane.b32.xlu0 %v631_v28, %s1904_s29  ;;  %s1494_s19 = smov 24  }
 0x38b   :  { %714 = vrot.lane.b32.xlu1 %v631_v28, %s1905_s10  ;;  %708 = vrot.lane.b32.xlu0 %v631_v28, %s1906_s0 }
 0x38f   :  { %720 = vrot.lane.b32.xlu0 %v631_v28, %s1482_s23  ;;  %730 = vrot.lane.b32.xlu1 %v728_v30, %s1485_s11  ;;  %s1495_s23 = smov 23  }
 0x393   :  { %737 = vrot.lane.b32.xlu0 %v728_v30, %s1487_s12  ;;  %743 = vrot.lane.b32.xlu1 %v728_v30, %s1488_s13 }
 0x397   :  { %749 = vrot.lane.b32.xlu0 %v728_v30, %s1489_s14  ;;  %755 = vrot.lane.b32.xlu1 %v728_v30, %s1490_s15 }
 0x39b   :  { %761 = vrot.lane.b32.xlu0 %v728_v30, %s1491_s16  ;;  %767 = vrot.lane.b32.xlu1 %v728_v30, %s1492_s17 }
 0x39f   :  { %773 = vrot.lane.b32.xlu0 %v728_v30, %s1493_s18  ;;  %779 = vrot.lane.b32.xlu1 %v728_v30, %s1494_s19 }
 0x3a3   :  { %785 = vrot.lane.b32.xlu0 %v728_v30, %s1495_s23  ;;  %791 = vrot.lane.b32.xlu1 %v728_v30, %s1496_s24 }
 0x3a7   :  { %797 = vrot.lane.b32.xlu0 %v728_v30, %s1497_s2  ;;  %803 = vrot.lane.b32.xlu1 %v728_v30, %s1498_s25 }
 0x3ab   :  { %809 = vrot.lane.b32.xlu0 %v728_v30, %s1499_s26  ;;  %815 = vrot.lane.b32.xlu1 %v728_v30, %s1500_s1 }
 0x3af   :  { %821 = vrot.lane.b32.xlu0 %v728_v30, %s1502_s27  ;;  %845 = vperm.xlu1 %1451, %v842_v32  }
 0x3e5   :  { %v637_v33 = vpop.permute.xlu0 %636  ;;  %v643_v34 = vpop.permute.xlu1 %642 }
 0x3e6   :  { %639 = vst.msk [vmem:[#allocation5 + $0x8] sm:$0xff] %vm632_vm6, %v637_v33  ;;  %645 = vst.msk [vmem:[#allocation5 + $0x10] sm:$0xff] %vm632_vm6, %v643_v34 }
 0x3e9   :  { %v649_v35 = vpop.permute.xlu0 %648  ;;  %v655_v37 = vpop.permute.xlu1 %654 }
 0x3ea   :  { %651 = vst.msk [vmem:[#allocation5 + $0x18] sm:$0xff] %vm632_vm6, %v649_v35  ;;  %657 = vst.msk [vmem:[#allocation5 + $0x20] sm:$0xff] %vm632_vm6, %v655_v37  ;;  %v1001_v35 = vld [vmem:[%s1898_s6 + $0x8] sm:$0xff]  ;;  %v1000_v37 = vld [vmem:[%s1898_s6] sm:$0xff] }
 0x3ed   :  { %v661_v1 = vpop.permute.xlu0 %660  ;;  %v667_v44 = vpop.permute.xlu1 %666 }
 0x3ee   :  { %663 = vst.msk [vmem:[#allocation5 + $0x28] sm:$0xff] %vm632_vm6, %v661_v1  ;;  %669 = vst.msk [vmem:[#allocation5 + $0x30] sm:$0xff] %vm632_vm6, %v667_v44 }
 0x3f1   :  { %v673_v45 = vpop.permute.xlu0 %672  ;;  %v679_v36 = vpop.permute.xlu1 %678 }
 0x3f2   :  { %675 = vst.msk [vmem:[#allocation5 + $0x38] sm:$0xff] %vm632_vm6, %v673_v45  ;;  %681 = vst.msk [vmem:[#allocation5 + $0x40] sm:$0xff] %vm632_vm6, %v679_v36  ;;  %v1002_v45 = vld [vmem:[%s1898_s6 + $0x10] sm:$0xff]  ;;  %v1003_v36 = vld [vmem:[%s1898_s6 + $0x18] sm:$0xff] }
 0x3f5   :  { %v685_v46 = vpop.permute.xlu0 %684  ;;  %v691_v47 = vpop.permute.xlu1 %690 }
 0x3f6   :  { %687 = vst.msk [vmem:[#allocation5 + $0x48] sm:$0xff] %vm632_vm6, %v685_v46  ;;  %693 = vst.msk [vmem:[#allocation5 + $0x50] sm:$0xff] %vm632_vm6, %v691_v47 }
 0x3f9   :  { %v697_v48 = vpop.permute.xlu0 %696  ;;  %v703_v49 = vpop.permute.xlu1 %702 }
 0x3fa   :  { %699 = vst.msk [vmem:[#allocation5 + $0x58] sm:$0xff] %vm632_vm6, %v697_v48  ;;  %705 = vst.msk [vmem:[#allocation5 + $0x60] sm:$0xff] %vm632_vm6, %v703_v49 }
 0x3fd   :  { %v709_v50 = vpop.permute.xlu0 %708  ;;  %v715_v51 = vpop.permute.xlu1 %714 }
 0x3fe   :  { %711 = vst.msk [vmem:[#allocation5 + $0x68] sm:$0xff] %vm632_vm6, %v709_v50  ;;  %717 = vst.msk [vmem:[#allocation5 + $0x70] sm:$0xff] %vm632_vm6, %v715_v51 }
 0x401   :  { %v721_v39 = vpop.permute.xlu0 %720  ;;  %v731_v52 = vpop.permute.xlu1 %730 }
 0x402   :  { %723 = vst.msk [vmem:[#allocation5 + $0x78] sm:$0xff] %vm632_vm6, %v721_v39 }
 0x403   :  { %734 = vst.msk [vmem:[#allocation5] sm:$0xff] %vm733_vm8, %v731_v52 }
 0x405   :  { %v738_v53 = vpop.permute.xlu0 %737  ;;  %v744_v54 = vpop.permute.xlu1 %743 }
 0x406   :  { %740 = vst.msk [vmem:[#allocation5 + $0x8] sm:$0xff] %vm733_vm8, %v738_v53  ;;  %746 = vst.msk [vmem:[#allocation5 + $0x10] sm:$0xff] %vm733_vm8, %v744_v54 }
 0x409   :  { %v750_v55 = vpop.permute.xlu0 %749  ;;  %v756_v56 = vpop.permute.xlu1 %755 }
 0x40a   :  { %752 = vst.msk [vmem:[#allocation5 + $0x18] sm:$0xff] %vm733_vm8, %v750_v55  ;;  %758 = vst.msk [vmem:[#allocation5 + $0x20] sm:$0xff] %vm733_vm8, %v756_v56  ;;  %v826_v59 = vld [vmem:[#allocation5] sm:$0xff] }
 0x40d   :  { %v762_v57 = vpop.permute.xlu0 %761  ;;  %v768_v58 = vpop.permute.xlu1 %767  ;;  %v827_v38 = vld [vmem:[#allocation5 + $0x8] sm:$0xff]  ;;  %v828_v63 = vld [vmem:[#allocation5 + $0x10] sm:$0xff] }
 0x40e   :  { %764 = vst.msk [vmem:[#allocation5 + $0x28] sm:$0xff] %vm733_vm8, %v762_v57  ;;  %770 = vst.msk [vmem:[#allocation5 + $0x30] sm:$0xff] %vm733_vm8, %v768_v58  ;;  %v1238_v60 = vpack.c.bf16 %v827_v38, %v826_v59  ;;  %v948_v59 = vlaneseq }
 0x410   :  { %1239 = vmatpush3.bf16.msra.mxu0 %v1238_v60  ;;  %v949_v38 = vand.u32 127, %v948_v59  ;;  %v951_v60 = vshrl.u32 %v948_v59, 7 }
 0x411   :  { %v774_v61 = vpop.permute.xlu0 %773  ;;  %v780_v62 = vpop.permute.xlu1 %779  ;;  %1240 = vmatprep.subr.bf16.mxu0 %v1486_v31  ;;  %v829_v0 = vld [vmem:[#allocation5 + $0x18] sm:$0xff]  ;;  %v830_v41 = vld [vmem:[#allocation5 + $0x20] sm:$0xff] }
 0x412   :  { %776 = vst.msk [vmem:[#allocation5 + $0x38] sm:$0xff] %vm733_vm8, %v774_v61  ;;  %782 = vst.msk [vmem:[#allocation5 + $0x40] sm:$0xff] %vm733_vm8, %v780_v62  ;;  %v1241_v2 = vpack.c.bf16 %v829_v0, %v828_v63  ;;  %v952_v61 = vsub.s32 %v949_v38, %v951_v60 }
 0x414   :  { %1242 = vmatpush3.bf16.msra.mxu0 %v1241_v2 }
 0x415   :  { %v786_v3 = vpop.permute.xlu0 %785  ;;  %v792_v4 = vpop.permute.xlu1 %791  ;;  %1243 = vmatprep.subr.bf16.mxu0 %v1486_v31  ;;  %v831_v6 = vld [vmem:[#allocation5 + $0x28] sm:$0xff]  ;;  %v832_v8 = vld [vmem:[#allocation5 + $0x30] sm:$0xff] }
 0x416   :  { %788 = vst.msk [vmem:[#allocation5 + $0x48] sm:$0xff] %vm733_vm8, %v786_v3  ;;  %794 = vst.msk [vmem:[#allocation5 + $0x50] sm:$0xff] %vm733_vm8, %v792_v4  ;;  %v1244_v7 = vpack.c.bf16 %v831_v6, %v830_v41 }
 0x418   :  { %1245 = vmatpush3.bf16.msra.mxu0 %v1244_v7 }
 0x419   :  { %v798_v9 = vpop.permute.xlu0 %797  ;;  %v804_v10 = vpop.permute.xlu1 %803  ;;  %1246 = vmatprep.subr.bf16.mxu0 %v1486_v31  ;;  %v833_v11 = vld [vmem:[#allocation5 + $0x38] sm:$0xff]  ;;  %v834_v13 = vld [vmem:[#allocation5 + $0x40] sm:$0xff] }
 0x41a   :  { %800 = vst.msk [vmem:[#allocation5 + $0x58] sm:$0xff] %vm733_vm8, %v798_v9  ;;  %806 = vst.msk [vmem:[#allocation5 + $0x60] sm:$0xff] %vm733_vm8, %v804_v10  ;;  %v1247_v40 = vpack.c.bf16 %v833_v11, %v832_v8 }
 0x41c   :  { %1248 = vmatpush3.bf16.msra.mxu0 %v1247_v40 }
 0x41d   :  { %v810_v12 = vpop.permute.xlu0 %809  ;;  %v816_v5 = vpop.permute.xlu1 %815  ;;  %1249 = vmatprep.subr.bf16.mxu0 %v1486_v31  ;;  %v835_v14 = vld [vmem:[#allocation5 + $0x48] sm:$0xff]  ;;  %v836_v16 = vld [vmem:[#allocation5 + $0x50] sm:$0xff] }
 0x41e   :  { %812 = vst.msk [vmem:[#allocation5 + $0x68] sm:$0xff] %vm733_vm8, %v810_v12  ;;  %818 = vst.msk [vmem:[#allocation5 + $0x70] sm:$0xff] %vm733_vm8, %v816_v5  ;;  %v1250_v15 = vpack.c.bf16 %v835_v14, %v834_v13 }
 0x420   :  { %1251 = vmatpush3.bf16.msra.mxu0 %v1250_v15 }
 0x421   :  { %v822_v43 = vpop.permute.xlu0 %821  ;;  %1252 = vmatprep.subr.bf16.mxu0 %v1486_v31  ;;  %v837_v17 = vld [vmem:[#allocation5 + $0x58] sm:$0xff]  ;;  %v838_v19 = vld [vmem:[#allocation5 + $0x60] sm:$0xff] }
 0x422   :  { %824 = vst.msk [vmem:[#allocation5 + $0x78] sm:$0xff] %vm733_vm8, %v822_v43  ;;  %v1253_v18 = vpack.c.bf16 %v837_v17, %v836_v16 }
 0x424   :  { %1254 = vmatpush3.bf16.msra.mxu0 %v1253_v18 }
 0x425   :  { %1255 = vmatprep.subr.bf16.mxu0 %v1486_v31  ;;  %v839_v20 = vld [vmem:[#allocation5 + $0x68] sm:$0xff]  ;;  %v840_v22 = vld [vmem:[#allocation5 + $0x70] sm:$0xff] }
 0x426   :  { %v1256_v21 = vpack.c.bf16 %v839_v20, %v838_v19  ;;  %v1051_v20 = vld [vmem:[%s1899_s7] sm:$0xf] }
 0x428   :  { %1257 = vmatpush3.bf16.msra.mxu0 %v1256_v21 }
 0x429   :  { %1258 = vmatprep.subr.bf16.mxu0 %v1486_v31  ;;  %v841_v23 = vld [vmem:[#allocation5 + $0x78] sm:$0xff] }
 0x42a   :  { %v1259_v24 = vpack.c.bf16 %v841_v23, %v840_v22 }
 0x42c   :  { %1260 = vmatpush3.bf16.msra.mxu0 %v1259_v24 }
 0x42e   :  { %v846_v42 = vpop.permute.xlu1 %845 }
 0x42f   :  { %1171 = vmatmul.mubr.f32.vlgmr.msra.gmra.mrb[2].mxu0 %v825_v25 }
 0x502   :  { %v914_v26 = vpop.f32.mrb[2].mxu0 }
 0x503   :  { %v915_v27 = vadd.f32 %v914_v26, %v846_v42  ;;  %v1172_v28 = vpop.f32.mrb[3].mxu0  ;;  %v977_v42 = vld [vmem:[%s1899_s7] sm:$0xf]  ;;  %s1504_s7 = smov 1  }
 0x505   :  { %v919_v29 = vmin.f32 %v915_v27, 0.0  ;;  %vm918_vm9 = vcmp.gt.f32.partialorder %v915_v27, 0.0 }
 0x507   :  { %v920_v30 = vmul.f32 1.442695, %v919_v29 }
 0x509   :  { %1456 = vpow2.f32 %v920_v30 }
 0x513   :  { %v1457_v32 = vpop.eup %1456 }
 0x514   :  { %v1085_v33 = vadd.f32 -1.0, %v1457_v32 }
 0x516   :  { %v923_v31 = vsel %vm918_vm9, %v915_v27, %v1085_v33 }
 0x517   :  { %1005 = vrot.lane.b32.xlu0 %v923_v31, %s1503_s20  ;;  %v929_v39 = vmul.f32 %v1001_v35, %v923_v31  ;;  %v928_v52 = vmul.f32 %v1000_v37, %v923_v31  ;;  %v931_v55 = vmul.f32 %v1003_v36, %v923_v31  ;;  %v930_v56 = vmul.f32 %v1002_v45, %v923_v31 }
 0x519   :  { %v935_v53 = vsel %vm632_vm6, %v929_v39, 0.0  ;;  %v932_v54 = vsel %vm632_vm6, %v928_v52, 0.0  ;;  %v941_v57 = vsel %vm632_vm6, %v931_v55, 0.0  ;;  %v938_v58 = vsel %vm632_vm6, %v930_v56, 0.0 }
 0x589   :  { %v1006_v34 = vpop.permute.xlu0 %1005 }
 0x58a   :  { %v1009_v1 = vmul.f32 %v1006_v34, %v1001_v35  ;;  %v1008_v44 = vmul.f32 %v1006_v34, %v1000_v37  ;;  %v1010_v48 = vmul.f32 %v1006_v34, %v1002_v45  ;;  %v1011_v49 = vmul.f32 %v1006_v34, %v1003_v36 }
 0x58c   :  { %v1015_v46 = vsel %vm632_vm6, %v1009_v1, 0.0  ;;  %v1012_v47 = vsel %vm632_vm6, %v1008_v44, 0.0  ;;  %v1018_v50 = vsel %vm632_vm6, %v1010_v48, 0.0  ;;  %v1021_v51 = vsel %vm632_vm6, %v1011_v49, 0.0 }
 0x58d   :  { %1016 = vadd.xlane.f32.xlu0 %v1015_v46  ;;  %1013 = vadd.xlane.f32.xlu1 %v1012_v47 }
 0x591   :  { %1019 = vadd.xlane.f32.xlu0 %v1018_v50  ;;  %1022 = vadd.xlane.f32.xlu1 %v1021_v51 }
 0x595   :  { %936 = vadd.xlane.f32.xlu1 %v935_v53  ;;  %933 = vadd.xlane.f32.xlu0 %v932_v54 }
 0x599   :  { %942 = vadd.xlane.f32.xlu1 %v941_v57  ;;  %939 = vadd.xlane.f32.xlu0 %v938_v58 }
 0x61a   :  { %v1017_v62 = vpop.xlane.xlu0 %1016  ;;  %v1014_v63 = vpop.xlane.xlu1 %1013 }
 0x61b   :  { %v1035_v0 = vrot.slane %v1017_v62, %v952_v61  ;;  %v1031_v2 = vrot.slane %v1014_v63, %v952_v61 }
 0x61d   :  { %v1044_v7 = vsel %vm966_vm10, %v1035_v0, %v1031_v2 }
 0x61e   :  { %v1020_v3 = vpop.xlane.xlu0 %1019  ;;  %v1023_v4 = vpop.xlane.xlu1 %1022 }
 0x61f   :  { %v1039_v41 = vrot.slane %v1020_v3, %v952_v61  ;;  %v1043_v6 = vrot.slane %v1023_v4, %v952_v61 }
 0x621   :  { %v1045_v9 = vsel %vm968_vm11, %v1039_v41, %v1044_v7 }
 0x622   :  { %v937_v10 = vpop.xlane.xlu1 %936  ;;  %v934_v8 = vpop.xlane.xlu0 %933  ;;  %v1046_v11 = vsel %vm970_vm12, %v1043_v6, %v1045_v9 }
 0x623   :  { %v1048_v40 = vsel %vm973_vm13, %v1046_v11, 0.0  ;;  %v957_v12 = vrot.slane %v937_v10, %v952_v61  ;;  %v953_v5 = vrot.slane %v934_v8, %v952_v61 }
 0x624   :  { %1049 = vadd.xlane.f32.xlu0 %v1048_v40 }
 0x625   :  { %v967_v16 = vsel %vm966_vm10, %v957_v12, %v953_v5 }
 0x626   :  { %v943_v13 = vpop.xlane.xlu1 %942  ;;  %v940_v14 = vpop.xlane.xlu0 %939 }
 0x627   :  { %v965_v15 = vrot.slane %v943_v13, %v952_v61  ;;  %v961_v43 = vrot.slane %v940_v14, %v952_v61 }
 0x629   :  { %v969_v17 = vsel %vm968_vm11, %v961_v43, %v967_v16 }
 0x62a   :  { %v971_v18 = vsel %vm970_vm12, %v965_v15, %v969_v17 }
 0x62b   :  { %v974_v19 = vsel %vm973_vm13, %v971_v18, 0.0 }
 0x62c   :  { %975 = vadd.xlane.f32.xlu1 %v974_v19 }
 0x6b1   :  { %v1050_v21 = vpop.xlane.xlu0 %1049 }
 0x6b2   :  { %v1052_v22 = vadd.f32 %v1051_v20, %v1050_v21 }
 0x6b4   :  { %v1053_v23 = vsel %vm979_vm14, %v1052_v22, -inf }
 0x6b5   :  { %v1054_v24 = vrot.slane %v1053_v23, 4 }
 0x6b7   :  { %v1055_v25 = vmax.f32 %v1053_v23, %v1054_v24 }
 0x6b9   :  { %v1056_v26 = vrot.slane %v1055_v25, 2  ;;  %v976_v27 = vpop.xlane.xlu1 %975 }
 0x6ba   :  { %v978_v28 = vadd.f32 %v977_v42, %v976_v27 }
 0x6bb   :  { %v1057_v29 = vmax.f32 %v1055_v25, %v1056_v26 }
 0x6bc   :  { %v980_v30 = vsel %vm979_vm14, %v978_v28, -inf }
 0x6bd   :  { %v1058_v32 = vrot.slane %v1057_v29, 1  ;;  %v981_v33 = vrot.slane %v980_v30, 4 }
 0x6bf   :  { %v1059_v31 = vmax.f32 %v1057_v29, %v1058_v32  ;;  %v982_v34 = vmax.f32 %v980_v30, %v981_v33 }
 0x6c1   :  { %v1060_v35 = vsub.f32 %v1052_v22, %v1059_v31  ;;  %v983_v37 = vrot.slane %v982_v34, 2 }
 0x6c3   :  { %v1061_v1 = vmul.f32 1.442695, %v1060_v35  ;;  %v984_v44 = vmax.f32 %v982_v34, %v983_v37 }
 0x6c5   :  { %1458 = vpow2.f32 %v1061_v1  ;;  %v985_v45 = vrot.slane %v984_v44, 1 }
 0x6c7   :  { %v986_v36 = vmax.f32 %v984_v44, %v985_v45 }
 0x6c9   :  { %v987_v46 = vsub.f32 %v978_v28, %v986_v36 }
 0x6cb   :  { %v988_v47 = vmul.f32 1.442695, %v987_v46 }
 0x6cd   :  { %1460 = vpow2.f32 %v988_v47 }
 0x6cf   :  { %v1459_v48 = vpop.eup %1458 }
 0x6d0   :  { %v1063_v49 = vsel %vm979_vm14, %v1459_v48, 0.0 }
 0x6d1   :  { %v1064_v50 = vrot.slane %v1063_v49, 4 }
 0x6d3   :  { %v1065_v51 = vadd.f32 %v1064_v50, %v1063_v49 }
 0x6d5   :  { %v1066_v39 = vrot.slane %v1065_v51, 2 }
 0x6d7   :  { %v1461_v52 = vpop.eup %1460  ;;  %v1067_v53 = vadd.f32 %v1066_v39, %v1065_v51 }
 0x6d8   :  { %v990_v54 = vsel %vm979_vm14, %v1461_v52, 0.0 }
 0x6d9   :  { %v991_v55 = vrot.slane %v990_v54, 4  ;;  %v1068_v56 = vrot.slane %v1067_v53, 1 }
 0x6db   :  { %v992_v57 = vadd.f32 %v991_v55, %v990_v54  ;;  %v1069_v58 = vadd.f32 %v1068_v56, %v1067_v53 }
 0x6dd   :  { %v993_v59 = vrot.slane %v992_v57, 2  ;;  %1462 = vrcp.f32 %v1069_v58 }
 0x6df   :  { %v994_v38 = vadd.f32 %v993_v59, %v992_v57 }
 0x6e1   :  { %v995_v60 = vrot.slane %v994_v38, 1 }
 0x6e3   :  { %v996_v61 = vadd.f32 %v995_v60, %v994_v38 }
 0x6e5   :  { %1464 = vrcp.f32 %v996_v61 }
 0x6e7   :  { %v1463_v62 = vpop.eup %1462 }
 0x6e8   :  { %v1071_v63 = vmul.f32 %v1463_v62, %v1459_v48 }
 0x6ea   :  { %1073 = vrot.lane.b32.xlu0 %v1071_v63, %s1504_s7 }
 0x6ef   :  { %v1465_v0 = vpop.eup %1464 }
 0x6f0   :  { %v998_v2 = vmul.f32 %v1465_v0, %v1461_v52 }
 0x6f2   :  { %999 = vst.msk [vmem:[%s1900_s8] sm:$0xf] %vm979_vm14, %v998_v2 }
 0x75c   :  { %v1074_v3 = vpop.permute.xlu0 %1073 }
 0x75d   :  { %1077 = vst.msk [vmem:[%s1900_s8] sm:$0xf] %vm1076_vm15, %v1074_v3 }

</bundles_post_ra>
